<compile_context>
chip_gen: v7x
topology: tpu7x:2x2x1
jax: 0.10.0
libtpu: 0.0.40
codegen_flags: <defaults>
</compile_context>

<pallas_src>
import functools

import jax
import jax.numpy as jnp
from jax.experimental import pallas as pl
from jax.experimental.pallas import tpu as pltpu


# ------------------------------- config -------------------------------------
BATCH = 2
SEQ = 8
HIDDEN = 32          # stand-in for bert-base hidden_size (768)
NUM_HEADS = 2
INTER = 64           # FFN intermediate size
NUM_LAYERS = 2
VOCAB = 50
MAX_POS = 16
PROJ_DIM = 512       # nn.Linear(hidden_size, 512) in feature_projection
BERT_LN_EPS = 1e-12
PROJ_LN_EPS = 1e-5   # nn.LayerNorm default


# ------------------------------ shared helper --------------------------------
def _layernorm(x, gamma, beta, eps):
    mu = jnp.mean(x, axis=-1, keepdims=True)
    var = jnp.mean(jnp.square(x - mu), axis=-1, keepdims=True)
    return (x - mu) * jax.lax.rsqrt(var + eps) * gamma + beta


# --------------------------- fused encoder kernel ----------------------------
def fused_text_encoder_kernel(x_ref, mask_ref,
                              wqkv_ref, bqkv_ref, wo_ref, bo_ref, ln1_ref,
                              w1_ref, b1_ref, w2_ref, b2_ref, ln2_ref,
                              pw_ref, pb_ref, pln_ref,
                              out_ref, act_ref, *, num_heads):
    layer = pl.program_id(0)

    # Resident activation (bf16): initialize once from the embedding output.
    @pl.when(layer == 0)
    def _():
        act_ref[...] = x_ref[...]

    x_bf = act_ref[...]                                 # (B, S, H) bf16, VMEM-resident
    B, S, H = x_bf.shape
    dh = H // num_heads
    BS = B * S
    x2d_bf = x_bf.reshape(BS, H)                        # MXU operand (no cast)
    x2d = x2d_bf.astype(jnp.float32)                    # single upcast: residual/LN path

    # ---- fused QKV projection: one (BS,H) x (H,3H) bf16 MXU matmul, f32 accumulate.
    # 1/sqrt(dh) is already folded into the Q columns of wqkv/bqkv (host-side).
    qkv = jnp.dot(x2d_bf, wqkv_ref[...],
                  preferred_element_type=jnp.float32) + bqkv_ref[...]      # (BS, 3H) f32

    mask = mask_ref[...]                                # (B, 1, S) additive mask

    # ---- per-head attention; output projection accumulated head-by-head (no concat).
    attn = jnp.zeros((BS, H), jnp.float32)
    for h in range(num_heads):
        o = h * dh
        q_h = qkv[:, o:o + dh].reshape(B, S, dh).astype(jnp.bfloat16)
        k_h = qkv[:, H + o:H + o + dh].reshape(B, S, dh).astype(jnp.bfloat16)
        v_h = qkv[:, 2 * H + o:2 * H + o + dh].reshape(B, S, dh).astype(jnp.bfloat16)

        s = jnp.einsum('bqd,bkd->bqk', q_h, k_h,
                       preferred_element_type=jnp.float32)                 # (B, S, S)
        s = s + mask                                                       # broadcast (B,1,S)
        s = s - jnp.max(s, axis=-1, keepdims=True)
        p = jnp.exp(s)                                                     # unnormalized probs
        l = jnp.sum(p, axis=-1, keepdims=True)                             # (B, S, 1)

        ctx = jnp.einsum('bqk,bkd->bqd', p.astype(jnp.bfloat16), v_h,
                         preferred_element_type=jnp.float32)               # (B, S, dh)
        # Deferred softmax normalization: rescale the small (B,S,dh) context, not (B,S,S).
        ctx = ctx * pl.reciprocal(l, approx=True)

        attn = attn + jnp.dot(ctx.reshape(BS, dh).astype(jnp.bfloat16), wo_ref[h],
                              preferred_element_type=jnp.float32)          # (BS, H)
    attn = attn + bo_ref[...]

    ln1 = ln1_ref[...]                                                     # (2, H)
    x1 = _layernorm(x2d + attn, ln1[0:1], ln1[1:2], BERT_LN_EPS)

    # ---- FFN (bf16 matmul operands, f32 accumulate + elementwise)
    h1 = jnp.dot(x1.astype(jnp.bfloat16), w1_ref[...],
                 preferred_element_type=jnp.float32) + b1_ref[...]
    # TODO(synk): HF BERT uses the exact erf GELU; the tanh approximation is kept to stay
    # on guaranteed-lowerable Pallas/Mosaic elementwise ops.
    h1 = jax.nn.gelu(h1, approximate=True)
    ffn = jnp.dot(h1.astype(jnp.bfloat16), w2_ref[...],
                  preferred_element_type=jnp.float32) + b2_ref[...]
    ln2 = ln2_ref[...]
    x2 = _layernorm(x1 + ffn, ln2[0:1], ln2[1:2], BERT_LN_EPS)

    # Single downcast on store (bf16 residency).
    act_ref[...] = x2.reshape(B, S, H).astype(jnp.bfloat16)

    # ---- fused feature_projection on the CLS token at the last layer
    @pl.when(layer == pl.num_programs(0) - 1)
    def _():
        cls = act_ref[:, 0, :]                                             # (B, H) bf16
        y = jnp.dot(cls, pw_ref[...],
                    preferred_element_type=jnp.float32) + pb_ref[...]      # (B, 512)
        pln = pln_ref[...]
        y = _layernorm(y, pln[0:1], pln[1:2], PROJ_LN_EPS)
        # Dropout(0.2) is identity in eval mode.
        out_ref[...] = jnp.maximum(y, 0.0)                                 # lane-dense writeback


# --------------------------------- wrapper -----------------------------------
def _whole_spec(a):
    nd = a.ndim
    return pl.BlockSpec(tuple(a.shape), lambda l: (0,) * nd)


def _per_layer_spec(a):
    nd = a.ndim
    return pl.BlockSpec((None,) + tuple(a.shape[1:]),
                        lambda l: (l,) + (0,) * (nd - 1))


def _nbytes(a):
    return int(a.size) * jnp.dtype(a.dtype).itemsize


@jax.jit
def text_feature_extractor_forward(params, input_ids, attention_mask):
    """Mirrors TextFeatureExtractor.forward (eval mode): returns [B, 512]."""
    B, S = input_ids.shape
    emb = params['embed']

    # Embedding lookup (gather) + embedding LayerNorm: plain-JAX glue.
    x = (emb['word'][input_ids]
         + emb['pos'][:S][None, :, :]
         + emb['type'][0][None, None, :]).astype(jnp.float32)
    x = _layernorm(x, emb['ln_g'], emb['ln_b'], BERT_LN_EPS)
    x = x.astype(jnp.bfloat16)                                  # bf16 residency from the start

    # Additive attention mask, passed once as (B, 1, S) (broadcast inside the kernel).
    add_mask = ((1.0 - attention_mask.astype(jnp.float32)) * (-10000.0))[:, None, :]

    st = params['stacked']
    pr = params['proj']
    args = (x, add_mask,
            st['wqkv'], st['bqkv'], st['wo'], st['bo'], st['ln1'],
            st['w1'], st['b1'], st['w2'], st['b2'], st['ln2'],
            pr['w'], pr['b'], pr['ln'])

    in_specs = ([_whole_spec(x), _whole_spec(add_mask)]
                + [_per_layer_spec(st[k]) for k in
                   ('wqkv', 'bqkv', 'wo', 'bo', 'ln1',
                    'w1', 'b1', 'w2', 'b2', 'ln2')]
                + [_whole_spec(pr['w']), _whole_spec(pr['b']), _whole_spec(pr['ln'])])

    grid_spec = pltpu.PrefetchScalarGridSpec(
        num_scalar_prefetch=0,
        grid=(NUM_LAYERS,),
        in_specs=in_specs,
        out_specs=pl.BlockSpec((B, PROJ_DIM), lambda l: (0, 0)),
        scratch_shapes=[pltpu.VMEM((B, S, HIDDEN), jnp.bfloat16)],   # resident activation (bf16)
    )

    # Explicit VMEM budget: double-buffered per-layer weight set + resident arrays + slack.
    per_layer_bytes = sum(_nbytes(v) for v in st.values()) // NUM_LAYERS
    resident_bytes = (_nbytes(x) + _nbytes(add_mask)
                      + sum(_nbytes(v) for v in pr.values())
                      + B * S * HIDDEN * 2 + B * PROJ_DIM * 4)
    vmem_limit = int(min(96 << 20, 2 * per_layer_bytes + resident_bytes + (8 << 20)))

    return pl.pallas_call(
        functools.partial(fused_text_encoder_kernel, num_heads=NUM_HEADS),
        out_shape=jax.ShapeDtypeStruct((B, PROJ_DIM), jnp.float32),
        grid_spec=grid_spec,
        compiler_params=pltpu.CompilerParams(
            # Layer axis is sequential (activation carried across it).
            dimension_semantics=("arbitrary",),
            vmem_limit_bytes=vmem_limit),
    )(*args)


# ------------------------------ parameter init --------------------------------
def init_params(key):
    def nrm(k, shape):
        return (0.02 * jax.random.normal(k, shape)).astype(jnp.float32)

    keys = iter(jax.random.split(key, 16))
    H, I, L, NH = HIDDEN, INTER, NUM_LAYERS, NUM_HEADS
    dh = H // NH
    qscale = 1.0 / (dh ** 0.5)

    # Fold the 1/sqrt(dh) attention scale into the Q projection (weights + bias), host-side.
    wqkv = nrm(next(keys), (L, H, 3 * H))
    wqkv = wqkv.at[:, :, :H].multiply(qscale)
    bqkv = jnp.zeros((L, 1, 3 * H), jnp.float32)
    bqkv = bqkv.at[:, :, :H].multiply(qscale)
    # Head-split output projection: (L, H, H) -> (L, nh, dh, H).
    wo = nrm(next(keys), (L, H, H)).reshape(L, NH, dh, H)

    params = {
        'embed': {
            'word': nrm(next(keys), (VOCAB, H)),
            'pos': nrm(next(keys), (MAX_POS, H)),
            'type': nrm(next(keys), (2, H)),
            'ln_g': jnp.ones((1, H), jnp.float32),
            'ln_b': jnp.zeros((1, H), jnp.float32),
        },
        # Per-layer weights stacked with a leading layer dim; matmul weights in bf16
        # (MXU operands), biases / LayerNorm params in f32.
        'stacked': {
            'wqkv': wqkv.astype(jnp.bfloat16),                   # fused Q|K|V, Q pre-scaled
            'bqkv': bqkv,
            'wo':   wo.astype(jnp.bfloat16),                     # (L, nh, dh, H)
            'bo':   jnp.zeros((L, 1, H), jnp.float32),
            'ln1':  jnp.stack([jnp.ones((L, H)), jnp.zeros((L, H))], axis=1).astype(jnp.float32),
            'w1':   nrm(next(keys), (L, H, I)).astype(jnp.bfloat16),
            'b1':   jnp.zeros((L, 1, I), jnp.float32),
            'w2':   nrm(next(keys), (L, I, H)).astype(jnp.bfloat16),
            'b2':   jnp.zeros((L, 1, H), jnp.float32),
            'ln2':  jnp.stack([jnp.ones((L, H)), jnp.zeros((L, H))], axis=1).astype(jnp.float32),
        },
        'proj': {
            'w':  nrm(next(keys), (H, PROJ_DIM)).astype(jnp.bfloat16),
            'b':  jnp.zeros((1, PROJ_DIM), jnp.float32),
            'ln': jnp.stack([jnp.ones((PROJ_DIM,)), jnp.zeros((PROJ_DIM,))],
                            axis=0).astype(jnp.float32),        # (2, 512)
        },
    }
    return params


# ----------------------------------- main -------------------------------------
if __name__ == "__main__":
    key = jax.random.PRNGKey(0)
    k_param, k_ids = jax.random.split(key)

    params = init_params(k_param)
    input_ids = jax.random.randint(k_ids, (BATCH, SEQ), 0, VOCAB, dtype=jnp.int32)
    # First 6 tokens valid, last 2 padded (exercises the additive mask).
    attention_mask = jnp.concatenate(
        [jnp.ones((BATCH, SEQ - 2), jnp.int32), jnp.zeros((BATCH, 2), jnp.int32)],
        axis=1)

    feats = text_feature_extractor_forward(params, input_ids, attention_mask)
    feats = jax.block_until_ready(feats)

    assert feats.shape == (BATCH, PROJ_DIM), feats.shape
    assert bool(jnp.all(jnp.isfinite(feats)))
    assert bool(jnp.all(feats >= 0.0))  # ReLU output
    # TODO(synk): pretrained bert-base-chinese weights cannot be loaded; a deterministic
    # synthetic mini-BERT is used in their place.
    print("KERNEL_OK")
</pallas_src>

<mosaic_0001>
module attributes {stable_mosaic.version = 11 : i64} {
  func.func @fused_text_encoder_kernel(%arg0: i32, %arg1: memref<2x8x32xbf16, #tpu.memory_space<vmem>>, %arg2: memref<2x1x8xf32, #tpu.memory_space<vmem>>, %arg3: memref<1x32x96xbf16, #tpu.memory_space<vmem>>, %arg4: memref<1x1x96xf32, #tpu.memory_space<vmem>>, %arg5: memref<1x2x16x32xbf16, #tpu.memory_space<vmem>>, %arg6: memref<1x1x32xf32, #tpu.memory_space<vmem>>, %arg7: memref<1x2x32xf32, #tpu.memory_space<vmem>>, %arg8: memref<1x32x64xbf16, #tpu.memory_space<vmem>>, %arg9: memref<1x1x64xf32, #tpu.memory_space<vmem>>, %arg10: memref<1x64x32xbf16, #tpu.memory_space<vmem>>, %arg11: memref<1x1x32xf32, #tpu.memory_space<vmem>>, %arg12: memref<1x2x32xf32, #tpu.memory_space<vmem>>, %arg13: memref<32x512xbf16, #tpu.memory_space<vmem>>, %arg14: memref<1x512xf32, #tpu.memory_space<vmem>>, %arg15: memref<2x512xf32, #tpu.memory_space<vmem>>, %arg16: memref<2x512xf32, #tpu.memory_space<vmem>>, %arg17: memref<2x8x32xbf16, #tpu.memory_space<vmem>>) attributes {dimension_semantics = [#tpu.dimension_semantics<arbitrary>], iteration_bounds = array<i64: 2>, scalar_prefetch = 0 : i64, scratch_operands = 1 : i64, tpu.core_type = #tpu.core_type<tc>, window_params = [{pipeline_mode = #tpu.pipeline_mode<synchronous>, transform_indices = @transform_0, window_bounds = array<i64: 2, 8, 32>}, {pipeline_mode = #tpu.pipeline_mode<synchronous>, transform_indices = @transform_1, window_bounds = array<i64: 2, 1, 8>}, {transform_indices = @transform_2, window_bounds = array<i64: 1, 32, 96>}, {transform_indices = @transform_3, window_bounds = array<i64: 1, 1, 96>}, {transform_indices = @transform_4, window_bounds = array<i64: 1, 2, 16, 32>}, {transform_indices = @transform_5, window_bounds = array<i64: 1, 1, 32>}, {transform_indices = @transform_6, window_bounds = array<i64: 1, 2, 32>}, {transform_indices = @transform_7, window_bounds = array<i64: 1, 32, 64>}, {transform_indices = @transform_8, window_bounds = array<i64: 1, 1, 64>}, {transform_indices = @transform_9, window_bounds = array<i64: 1, 64, 32>}, {transform_indices = @transform_10, window_bounds = array<i64: 1, 1, 32>}, {transform_indices = @transform_11, window_bounds = array<i64: 1, 2, 32>}, {pipeline_mode = #tpu.pipeline_mode<synchronous>, transform_indices = @transform_12, window_bounds = array<i64: 32, 512>}, {pipeline_mode = #tpu.pipeline_mode<synchronous>, transform_indices = @transform_13, window_bounds = array<i64: 1, 512>}, {pipeline_mode = #tpu.pipeline_mode<synchronous>, transform_indices = @transform_14, window_bounds = array<i64: 2, 512>}, {pipeline_mode = #tpu.pipeline_mode<synchronous>, transform_indices = @transform_15, window_bounds = array<i64: 2, 512>}]} {
    %c0_i32 = arith.constant 0 : i32
    %0 = arith.cmpi eq, %arg0, %c0_i32 : i32
    %1 = arith.extui %0 : i1 to i32
    %c0_i32_0 = arith.constant 0 : i32
    %2 = arith.cmpi ne, %1, %c0_i32_0 : i32
    scf.if %2 {
      %c0_71 = arith.constant 0 : index
      %c0_72 = arith.constant 0 : index
      %c0_73 = arith.constant 0 : index
      %168 = vector.load %arg1[%c0_71, %c0_72, %c0_73] : memref<2x8x32xbf16, #tpu.memory_space<vmem>>, vector<2x8x32xbf16>
      %c0_74 = arith.constant 0 : index
      %c0_75 = arith.constant 0 : index
      %c0_76 = arith.constant 0 : index
      %169 = vector.load %arg17[%c0_74, %c0_75, %c0_76] : memref<2x8x32xbf16, #tpu.memory_space<vmem>>, vector<2x8x32xbf16>
      tpu.vector_store %arg17[%c0_74, %c0_75, %c0_76], %168 {strides = array<i32>} : memref<2x8x32xbf16, #tpu.memory_space<vmem>>, vector<2x8x32xbf16>,
    } else {
    }
    %c0 = arith.constant 0 : index
    %c0_1 = arith.constant 0 : index
    %c0_2 = arith.constant 0 : index
    %3 = vector.load %arg17[%c0, %c0_1, %c0_2] : memref<2x8x32xbf16, #tpu.memory_space<vmem>>, vector<2x8x32xbf16>
    %4 = vector.shape_cast %3 : vector<2x8x32xbf16> to vector<16x32xbf16>
    %5 = arith.extf %4 : vector<16x32xbf16> to vector<16x32xf32>
    %c0_3 = arith.constant 0 : index
    %c0_4 = arith.constant 0 : index
    %c0_5 = arith.constant 0 : index
    %6 = vector.load %arg3[%c0_3, %c0_4, %c0_5] : memref<1x32x96xbf16, #tpu.memory_space<vmem>>, vector<1x32x96xbf16>
    %7 = vector.shape_cast %6 : vector<1x32x96xbf16> to vector<32x96xbf16>
    %cst = arith.constant dense<0.000000e+00> : vector<16x96xf32>
    %8 = tpu.matmul %4, %7, %cst {dimension_numbers = #tpu.dot_dimension_numbers<[1], [0], [0], [1], [0, 0, 1, 1], [], []>} : vector<16x32xbf16>, vector<32x96xbf16>, vector<16x96xf32> -> vector<16x96xf32>
    %c0_6 = arith.constant 0 : index
    %c0_7 = arith.constant 0 : index
    %c0_8 = arith.constant 0 : index
    %9 = vector.load %arg4[%c0_6, %c0_7, %c0_8] : memref<1x1x96xf32, #tpu.memory_space<vmem>>, vector<1x1x96xf32>
    %10 = vector.shape_cast %9 : vector<1x1x96xf32> to vector<1x96xf32>
    %11 = vector.broadcast %10 : vector<1x96xf32> to vector<16x96xf32>
    %12 = arith.addf %8, %11 : vector<16x96xf32>
    %c0_9 = arith.constant 0 : index
    %c0_10 = arith.constant 0 : index
    %c0_11 = arith.constant 0 : index
    %13 = vector.load %arg2[%c0_9, %c0_10, %c0_11] : memref<2x1x8xf32, #tpu.memory_space<vmem>>, vector<2x1x8xf32>
    %cst_12 = arith.constant 0.000000e+00 : f32
    %14 = vector.broadcast %cst_12 : f32 to vector<16x32xf32>
    %15 = vector.extract_strided_slice %12 {offsets = [0, 0], sizes = [16, 16], strides = [1, 1]} : vector<16x96xf32> to vector<16x16xf32>
    %16 = vector.shape_cast %15 : vector<16x16xf32> to vector<2x8x16xf32>
    %17 = arith.truncf %16 : vector<2x8x16xf32> to vector<2x8x16xbf16>
    %18 = vector.extract_strided_slice %12 {offsets = [0, 32], sizes = [16, 16], strides = [1, 1]} : vector<16x96xf32> to vector<16x16xf32>
    %19 = vector.shape_cast %18 : vector<16x16xf32> to vector<2x8x16xf32>
    %20 = arith.truncf %19 : vector<2x8x16xf32> to vector<2x8x16xbf16>
    %21 = vector.extract_strided_slice %12 {offsets = [0, 64], sizes = [16, 16], strides = [1, 1]} : vector<16x96xf32> to vector<16x16xf32>
    %22 = vector.shape_cast %21 : vector<16x16xf32> to vector<2x8x16xf32>
    %23 = arith.truncf %22 : vector<2x8x16xf32> to vector<2x8x16xbf16>
    "tpu.trace_start"() <{level = 10 : i32, message = "bqd,bkd->bqk"}> : () -> ()
    %cst_13 = arith.constant dense<0.000000e+00> : vector<2x8x8xf32>
    %24 = tpu.matmul %17, %20, %cst_13 {dimension_numbers = #tpu.dot_dimension_numbers<[2], [2], [1], [1], [0, 0, 0, 1, 1, 1], [0], [0]>} : vector<2x8x16xbf16>, vector<2x8x16xbf16>, vector<2x8x8xf32> -> vector<2x8x8xf32>
    "tpu.trace_stop"() : () -> ()
    %25 = vector.broadcast %13 : vector<2x1x8xf32> to vector<2x8x8xf32>
    %26 = arith.addf %24, %25 : vector<2x8x8xf32>
    %cst_14 = arith.constant dense<0xFF800000> : vector<2x8xf32>
    %27 = vector.multi_reduction <maximumf>, %26, %cst_14 [2] : vector<2x8x8xf32> to vector<2x8xf32>
    %28 = vector.shape_cast %27 : vector<2x8xf32> to vector<2x8x1xf32>
    %29 = vector.broadcast %28 : vector<2x8x1xf32> to vector<2x8x8xf32>
    %30 = arith.subf %26, %29 : vector<2x8x8xf32>
    %31 = math.exp %30 : vector<2x8x8xf32>
    %cst_15 = arith.constant dense<0.000000e+00> : vector<2x8xf32>
    %32 = vector.multi_reduction <add>, %31, %cst_15 [2] : vector<2x8x8xf32> to vector<2x8xf32>
    %33 = vector.shape_cast %32 : vector<2x8xf32> to vector<2x8x1xf32>
    %34 = arith.truncf %31 : vector<2x8x8xf32> to vector<2x8x8xbf16>
    "tpu.trace_start"() <{level = 10 : i32, message = "bqk,bkd->bqd"}> : () -> ()
    %cst_16 = arith.constant dense<0.000000e+00> : vector<2x8x16xf32>
    %35 = tpu.matmul %34, %23, %cst_16 {dimension_numbers = #tpu.dot_dimension_numbers<[2], [1], [1], [2], [0, 0, 0, 1, 1, 2], [0], [0]>} : vector<2x8x8xbf16>, vector<2x8x16xbf16>, vector<2x8x16xf32> -> vector<2x8x16xf32>
    "tpu.trace_stop"() : () -> ()
    %36 = tpu.reciprocal %33 {approx = true} : vector<2x8x1xf32> -> vector<2x8x1xf32>
    %37 = vector.broadcast %36 : vector<2x8x1xf32> to vector<2x8x16xf32>
    %38 = arith.mulf %35, %37 : vector<2x8x16xf32>
    %39 = vector.shape_cast %38 : vector<2x8x16xf32> to vector<16x16xf32>
    %40 = arith.truncf %39 : vector<16x16xf32> to vector<16x16xbf16>
    %c0_17 = arith.constant 0 : index
    %c0_18 = arith.constant 0 : index
    %c0_19 = arith.constant 0 : index
    %c0_20 = arith.constant 0 : index
    %41 = vector.load %arg5[%c0_17, %c0_18, %c0_19, %c0_20] : memref<1x2x16x32xbf16, #tpu.memory_space<vmem>>, vector<1x1x16x32xbf16>
    %42 = vector.shape_cast %41 : vector<1x1x16x32xbf16> to vector<16x32xbf16>
    %cst_21 = arith.constant dense<0.000000e+00> : vector<16x32xf32>
    %43 = tpu.matmul %40, %42, %cst_21 {dimension_numbers = #tpu.dot_dimension_numbers<[1], [0], [0], [1], [0, 0, 1, 1], [], []>} : vector<16x16xbf16>, vector<16x32xbf16>, vector<16x32xf32> -> vector<16x32xf32>
    %44 = arith.addf %14, %43 : vector<16x32xf32>
    %45 = vector.extract_strided_slice %12 {offsets = [0, 16], sizes = [16, 16], strides = [1, 1]} : vector<16x96xf32> to vector<16x16xf32>
    %46 = vector.shape_cast %45 : vector<16x16xf32> to vector<2x8x16xf32>
    %47 = arith.truncf %46 : vector<2x8x16xf32> to vector<2x8x16xbf16>
    %48 = vector.extract_strided_slice %12 {offsets = [0, 48], sizes = [16, 16], strides = [1, 1]} : vector<16x96xf32> to vector<16x16xf32>
    %49 = vector.shape_cast %48 : vector<16x16xf32> to vector<2x8x16xf32>
    %50 = arith.truncf %49 : vector<2x8x16xf32> to vector<2x8x16xbf16>
    %51 = vector.extract_strided_slice %12 {offsets = [0, 80], sizes = [16, 16], strides = [1, 1]} : vector<16x96xf32> to vector<16x16xf32>
    %52 = vector.shape_cast %51 : vector<16x16xf32> to vector<2x8x16xf32>
    %53 = arith.truncf %52 : vector<2x8x16xf32> to vector<2x8x16xbf16>
    "tpu.trace_start"() <{level = 10 : i32, message = "bqd,bkd->bqk"}> : () -> ()
    %cst_22 = arith.constant dense<0.000000e+00> : vector<2x8x8xf32>
    %54 = tpu.matmul %47, %50, %cst_22 {dimension_numbers = #tpu.dot_dimension_numbers<[2], [2], [1], [1], [0, 0, 0, 1, 1, 1], [0], [0]>} : vector<2x8x16xbf16>, vector<2x8x16xbf16>, vector<2x8x8xf32> -> vector<2x8x8xf32>
    "tpu.trace_stop"() : () -> ()
    %55 = vector.broadcast %13 : vector<2x1x8xf32> to vector<2x8x8xf32>
    %56 = arith.addf %54, %55 : vector<2x8x8xf32>
    %cst_23 = arith.constant dense<0xFF800000> : vector<2x8xf32>
    %57 = vector.multi_reduction <maximumf>, %56, %cst_23 [2] : vector<2x8x8xf32> to vector<2x8xf32>
    %58 = vector.shape_cast %57 : vector<2x8xf32> to vector<2x8x1xf32>
    %59 = vector.broadcast %58 : vector<2x8x1xf32> to vector<2x8x8xf32>
    %60 = arith.subf %56, %59 : vector<2x8x8xf32>
    %61 = math.exp %60 : vector<2x8x8xf32>
    %cst_24 = arith.constant dense<0.000000e+00> : vector<2x8xf32>
    %62 = vector.multi_reduction <add>, %61, %cst_24 [2] : vector<2x8x8xf32> to vector<2x8xf32>
    %63 = vector.shape_cast %62 : vector<2x8xf32> to vector<2x8x1xf32>
    %64 = arith.truncf %61 : vector<2x8x8xf32> to vector<2x8x8xbf16>
    "tpu.trace_start"() <{level = 10 : i32, message = "bqk,bkd->bqd"}> : () -> ()
    %cst_25 = arith.constant dense<0.000000e+00> : vector<2x8x16xf32>
    %65 = tpu.matmul %64, %53, %cst_25 {dimension_numbers = #tpu.dot_dimension_numbers<[2], [1], [1], [2], [0, 0, 0, 1, 1, 2], [0], [0]>} : vector<2x8x8xbf16>, vector<2x8x16xbf16>, vector<2x8x16xf32> -> vector<2x8x16xf32>
    "tpu.trace_stop"() : () -> ()
    %66 = tpu.reciprocal %63 {approx = true} : vector<2x8x1xf32> -> vector<2x8x1xf32>
    %67 = vector.broadcast %66 : vector<2x8x1xf32> to vector<2x8x16xf32>
    %68 = arith.mulf %65, %67 : vector<2x8x16xf32>
    %69 = vector.shape_cast %68 : vector<2x8x16xf32> to vector<16x16xf32>
    %70 = arith.truncf %69 : vector<16x16xf32> to vector<16x16xbf16>
    %c0_26 = arith.constant 0 : index
    %c1 = arith.constant 1 : index
    %c0_27 = arith.constant 0 : index
    %c0_28 = arith.constant 0 : index
    %71 = vector.load %arg5[%c0_26, %c1, %c0_27, %c0_28] : memref<1x2x16x32xbf16, #tpu.memory_space<vmem>>, vector<1x1x16x32xbf16>
    %72 = vector.shape_cast %71 : vector<1x1x16x32xbf16> to vector<16x32xbf16>
    %cst_29 = arith.constant dense<0.000000e+00> : vector<16x32xf32>
    %73 = tpu.matmul %70, %72, %cst_29 {dimension_numbers = #tpu.dot_dimension_numbers<[1], [0], [0], [1], [0, 0, 1, 1], [], []>} : vector<16x16xbf16>, vector<16x32xbf16>, vector<16x32xf32> -> vector<16x32xf32>
    %74 = arith.addf %44, %73 : vector<16x32xf32>
    %c0_30 = arith.constant 0 : index
    %c0_31 = arith.constant 0 : index
    %c0_32 = arith.constant 0 : index
    %75 = vector.load %arg6[%c0_30, %c0_31, %c0_32] : memref<1x1x32xf32, #tpu.memory_space<vmem>>, vector<1x1x32xf32>
    %76 = vector.shape_cast %75 : vector<1x1x32xf32> to vector<1x32xf32>
    %77 = vector.broadcast %76 : vector<1x32xf32> to vector<16x32xf32>
    %78 = arith.addf %74, %77 : vector<16x32xf32>
    %c0_33 = arith.constant 0 : index
    %c0_34 = arith.constant 0 : index
    %c0_35 = arith.constant 0 : index
    %79 = vector.load %arg7[%c0_33, %c0_34, %c0_35] : memref<1x2x32xf32, #tpu.memory_space<vmem>>, vector<1x2x32xf32>
    %80 = vector.shape_cast %79 : vector<1x2x32xf32> to vector<2x32xf32>
    %81 = arith.addf %5, %78 : vector<16x32xf32>
    %82 = vector.extract_strided_slice %80 {offsets = [0, 0], sizes = [1, 32], strides = [1, 1]} : vector<2x32xf32> to vector<1x32xf32>
    %83 = vector.extract_strided_slice %80 {offsets = [1, 0], sizes = [1, 32], strides = [1, 1]} : vector<2x32xf32> to vector<1x32xf32>
    %cst_36 = arith.constant dense<0.000000e+00> : vector<16xf32>
    %84 = vector.multi_reduction <add>, %81, %cst_36 [1] : vector<16x32xf32> to vector<16xf32>
    %85 = vector.shape_cast %84 : vector<16xf32> to vector<16x1xf32>
    %cst_37 = arith.constant 3.200000e+01 : f32
    %86 = vector.broadcast %cst_37 : f32 to vector<16x1xf32>
    %87 = arith.divf %85, %86 : vector<16x1xf32>
    %88 = vector.broadcast %87 : vector<16x1xf32> to vector<16x32xf32>
    %89 = arith.subf %81, %88 : vector<16x32xf32>
    %90 = arith.mulf %89, %89 : vector<16x32xf32>
    %cst_38 = arith.constant dense<0.000000e+00> : vector<16xf32>
    %91 = vector.multi_reduction <add>, %90, %cst_38 [1] : vector<16x32xf32> to vector<16xf32>
    %92 = vector.shape_cast %91 : vector<16xf32> to vector<16x1xf32>
    %cst_39 = arith.constant 3.200000e+01 : f32
    %93 = vector.broadcast %cst_39 : f32 to vector<16x1xf32>
    %94 = arith.divf %92, %93 : vector<16x1xf32>
    %95 = vector.broadcast %87 : vector<16x1xf32> to vector<16x32xf32>
    %96 = arith.subf %81, %95 : vector<16x32xf32>
    %cst_40 = arith.constant 9.99999996E-13 : f32
    %97 = vector.broadcast %cst_40 : f32 to vector<16x1xf32>
    %98 = arith.addf %94, %97 : vector<16x1xf32>
    %99 = math.rsqrt %98 : vector<16x1xf32>
    %100 = vector.broadcast %99 : vector<16x1xf32> to vector<16x32xf32>
    %101 = arith.mulf %96, %100 : vector<16x32xf32>
    %102 = vector.broadcast %82 : vector<1x32xf32> to vector<16x32xf32>
    %103 = arith.mulf %101, %102 : vector<16x32xf32>
    %104 = vector.broadcast %83 : vector<1x32xf32> to vector<16x32xf32>
    %105 = arith.addf %103, %104 : vector<16x32xf32>
    %106 = arith.truncf %105 : vector<16x32xf32> to vector<16x32xbf16>
    %c0_41 = arith.constant 0 : index
    %c0_42 = arith.constant 0 : index
    %c0_43 = arith.constant 0 : index
    %107 = vector.load %arg8[%c0_41, %c0_42, %c0_43] : memref<1x32x64xbf16, #tpu.memory_space<vmem>>, vector<1x32x64xbf16>
    %108 = vector.shape_cast %107 : vector<1x32x64xbf16> to vector<32x64xbf16>
    %cst_44 = arith.constant dense<0.000000e+00> : vector<16x64xf32>
    %109 = tpu.matmul %106, %108, %cst_44 {dimension_numbers = #tpu.dot_dimension_numbers<[1], [0], [0], [1], [0, 0, 1, 1], [], []>} : vector<16x32xbf16>, vector<32x64xbf16>, vector<16x64xf32> -> vector<16x64xf32>
    %c0_45 = arith.constant 0 : index
    %c0_46 = arith.constant 0 : index
    %c0_47 = arith.constant 0 : index
    %110 = vector.load %arg9[%c0_45, %c0_46, %c0_47] : memref<1x1x64xf32, #tpu.memory_space<vmem>>, vector<1x1x64xf32>
    %111 = vector.shape_cast %110 : vector<1x1x64xf32> to vector<1x64xf32>
    %112 = vector.broadcast %111 : vector<1x64xf32> to vector<16x64xf32>
    %113 = arith.addf %109, %112 : vector<16x64xf32>
    %114 = arith.mulf %113, %113 : vector<16x64xf32>
    %115 = arith.mulf %113, %114 : vector<16x64xf32>
    %cst_48 = arith.constant 4.471500e-02 : f32
    %116 = vector.broadcast %cst_48 : f32 to vector<16x64xf32>
    %117 = arith.mulf %116, %115 : vector<16x64xf32>
    %118 = arith.addf %113, %117 : vector<16x64xf32>
    %cst_49 = arith.constant 0.797884583 : f32
    %119 = vector.broadcast %cst_49 : f32 to vector<16x64xf32>
    %120 = arith.mulf %119, %118 : vector<16x64xf32>
    %121 = math.tanh %120 : vector<16x64xf32>
    %cst_50 = arith.constant 1.000000e+00 : f32
    %122 = vector.broadcast %cst_50 : f32 to vector<16x64xf32>
    %123 = arith.addf %122, %121 : vector<16x64xf32>
    %cst_51 = arith.constant 5.000000e-01 : f32
    %124 = vector.broadcast %cst_51 : f32 to vector<16x64xf32>
    %125 = arith.mulf %124, %123 : vector<16x64xf32>
    %126 = arith.mulf %113, %125 : vector<16x64xf32>
    %127 = arith.truncf %126 : vector<16x64xf32> to vector<16x64xbf16>
    %c0_52 = arith.constant 0 : index
    %c0_53 = arith.constant 0 : index
    %c0_54 = arith.constant 0 : index
    %128 = vector.load %arg10[%c0_52, %c0_53, %c0_54] : memref<1x64x32xbf16, #tpu.memory_space<vmem>>, vector<1x64x32xbf16>
    %129 = vector.shape_cast %128 : vector<1x64x32xbf16> to vector<64x32xbf16>
    %cst_55 = arith.constant dense<0.000000e+00> : vector<16x32xf32>
    %130 = tpu.matmul %127, %129, %cst_55 {dimension_numbers = #tpu.dot_dimension_numbers<[1], [0], [0], [1], [0, 0, 1, 1], [], []>} : vector<16x64xbf16>, vector<64x32xbf16>, vector<16x32xf32> -> vector<16x32xf32>
    %c0_56 = arith.constant 0 : index
    %c0_57 = arith.constant 0 : index
    %c0_58 = arith.constant 0 : index
    %131 = vector.load %arg11[%c0_56, %c0_57, %c0_58] : memref<1x1x32xf32, #tpu.memory_space<vmem>>, vector<1x1x32xf32>
    %132 = vector.shape_cast %131 : vector<1x1x32xf32> to vector<1x32xf32>
    %133 = vector.broadcast %132 : vector<1x32xf32> to vector<16x32xf32>
    %134 = arith.addf %130, %133 : vector<16x32xf32>
    %c0_59 = arith.constant 0 : index
    %c0_60 = arith.constant 0 : index
    %c0_61 = arith.constant 0 : index
    %135 = vector.load %arg12[%c0_59, %c0_60, %c0_61] : memref<1x2x32xf32, #tpu.memory_space<vmem>>, vector<1x2x32xf32>
    %136 = vector.shape_cast %135 : vector<1x2x32xf32> to vector<2x32xf32>
    %137 = arith.addf %105, %134 : vector<16x32xf32>
    %138 = vector.extract_strided_slice %136 {offsets = [0, 0], sizes = [1, 32], strides = [1, 1]} : vector<2x32xf32> to vector<1x32xf32>
    %139 = vector.extract_strided_slice %136 {offsets = [1, 0], sizes = [1, 32], strides = [1, 1]} : vector<2x32xf32> to vector<1x32xf32>
    %cst_62 = arith.constant dense<0.000000e+00> : vector<16xf32>
    %140 = vector.multi_reduction <add>, %137, %cst_62 [1] : vector<16x32xf32> to vector<16xf32>
    %141 = vector.shape_cast %140 : vector<16xf32> to vector<16x1xf32>
    %cst_63 = arith.constant 3.200000e+01 : f32
    %142 = vector.broadcast %cst_63 : f32 to vector<16x1xf32>
    %143 = arith.divf %141, %142 : vector<16x1xf32>
    %144 = vector.broadcast %143 : vector<16x1xf32> to vector<16x32xf32>
    %145 = arith.subf %137, %144 : vector<16x32xf32>
    %146 = arith.mulf %145, %145 : vector<16x32xf32>
    %cst_64 = arith.constant dense<0.000000e+00> : vector<16xf32>
    %147 = vector.multi_reduction <add>, %146, %cst_64 [1] : vector<16x32xf32> to vector<16xf32>
    %148 = vector.shape_cast %147 : vector<16xf32> to vector<16x1xf32>
    %cst_65 = arith.constant 3.200000e+01 : f32
    %149 = vector.broadcast %cst_65 : f32 to vector<16x1xf32>
    %150 = arith.divf %148, %149 : vector<16x1xf32>
    %151 = vector.broadcast %143 : vector<16x1xf32> to vector<16x32xf32>
    %152 = arith.subf %137, %151 : vector<16x32xf32>
    %cst_66 = arith.constant 9.99999996E-13 : f32
    %153 = vector.broadcast %cst_66 : f32 to vector<16x1xf32>
    %154 = arith.addf %150, %153 : vector<16x1xf32>
    %155 = math.rsqrt %154 : vector<16x1xf32>
    %156 = vector.broadcast %155 : vector<16x1xf32> to vector<16x32xf32>
    %157 = arith.mulf %152, %156 : vector<16x32xf32>
    %158 = vector.broadcast %138 : vector<1x32xf32> to vector<16x32xf32>
    %159 = arith.mulf %157, %158 : vector<16x32xf32>
    %160 = vector.broadcast %139 : vector<1x32xf32> to vector<16x32xf32>
    %161 = arith.addf %159, %160 : vector<16x32xf32>
    %162 = vector.shape_cast %161 : vector<16x32xf32> to vector<2x8x32xf32>
    %163 = arith.truncf %162 : vector<2x8x32xf32> to vector<2x8x32xbf16>
    %c0_67 = arith.constant 0 : index
    %c0_68 = arith.constant 0 : index
    %c0_69 = arith.constant 0 : index
    %164 = vector.load %arg17[%c0_67, %c0_68, %c0_69] : memref<2x8x32xbf16, #tpu.memory_space<vmem>>, vector<2x8x32xbf16>
    tpu.vector_store %arg17[%c0_67, %c0_68, %c0_69], %163 {strides = array<i32>} : memref<2x8x32xbf16, #tpu.memory_space<vmem>>, vector<2x8x32xbf16>,
    %c1_i32 = arith.constant 1 : i32
    %165 = arith.cmpi eq, %arg0, %c1_i32 : i32
    %166 = arith.extui %165 : i1 to i32
    %c0_i32_70 = arith.constant 0 : i32
    %167 = arith.cmpi ne, %166, %c0_i32_70 : i32
    scf.if %167 {
      %c0_71 = arith.constant 0 : index
      %c0_72 = arith.constant 0 : index
      %c0_73 = arith.constant 0 : index
      %168 = vector.load %arg17[%c0_71, %c0_72, %c0_73] : memref<2x8x32xbf16, #tpu.memory_space<vmem>>, vector<2x1x32xbf16>
      %169 = vector.shape_cast %168 : vector<2x1x32xbf16> to vector<2x32xbf16>
      %c0_74 = arith.constant 0 : index
      %c0_75 = arith.constant 0 : index
      %170 = vector.load %arg13[%c0_74, %c0_75] : memref<32x512xbf16, #tpu.memory_space<vmem>>, vector<32x512xbf16>
      %cst_76 = arith.constant dense<0.000000e+00> : vector<2x512xf32>
      %171 = tpu.matmul %169, %170, %cst_76 {dimension_numbers = #tpu.dot_dimension_numbers<[1], [0], [0], [1], [0, 0, 1, 1], [], []>} : vector<2x32xbf16>, vector<32x512xbf16>, vector<2x512xf32> -> vector<2x512xf32>
      %c0_77 = arith.constant 0 : index
      %c0_78 = arith.constant 0 : index
      %172 = vector.load %arg14[%c0_77, %c0_78] : memref<1x512xf32, #tpu.memory_space<vmem>>, vector<1x512xf32>
      %173 = vector.broadcast %172 : vector<1x512xf32> to vector<2x512xf32>
      %174 = arith.addf %171, %173 : vector<2x512xf32>
      %c0_79 = arith.constant 0 : index
      %c0_80 = arith.constant 0 : index
      %175 = vector.load %arg15[%c0_79, %c0_80] : memref<2x512xf32, #tpu.memory_space<vmem>>, vector<2x512xf32>
      %176 = vector.extract_strided_slice %175 {offsets = [0, 0], sizes = [1, 512], strides = [1, 1]} : vector<2x512xf32> to vector<1x512xf32>
      %177 = vector.extract_strided_slice %175 {offsets = [1, 0], sizes = [1, 512], strides = [1, 1]} : vector<2x512xf32> to vector<1x512xf32>
      %cst_81 = arith.constant dense<0.000000e+00> : vector<2xf32>
      %178 = vector.multi_reduction <add>, %174, %cst_81 [1] : vector<2x512xf32> to vector<2xf32>
      %179 = vector.shape_cast %178 : vector<2xf32> to vector<2x1xf32>
      %cst_82 = arith.constant 5.120000e+02 : f32
      %180 = vector.broadcast %cst_82 : f32 to vector<2x1xf32>
      %181 = arith.divf %179, %180 : vector<2x1xf32>
      %182 = vector.broadcast %181 : vector<2x1xf32> to vector<2x512xf32>
      %183 = arith.subf %174, %182 : vector<2x512xf32>
      %184 = arith.mulf %183, %183 : vector<2x512xf32>
      %cst_83 = arith.constant dense<0.000000e+00> : vector<2xf32>
      %185 = vector.multi_reduction <add>, %184, %cst_83 [1] : vector<2x512xf32> to vector<2xf32>
      %186 = vector.shape_cast %185 : vector<2xf32> to vector<2x1xf32>
      %cst_84 = arith.constant 5.120000e+02 : f32
      %187 = vector.broadcast %cst_84 : f32 to vector<2x1xf32>
      %188 = arith.divf %186, %187 : vector<2x1xf32>
      %189 = vector.broadcast %181 : vector<2x1xf32> to vector<2x512xf32>
      %190 = arith.subf %174, %189 : vector<2x512xf32>
      %cst_85 = arith.constant 9.99999974E-6 : f32
      %191 = vector.broadcast %cst_85 : f32 to vector<2x1xf32>
      %192 = arith.addf %188, %191 : vector<2x1xf32>
      %193 = math.rsqrt %192 : vector<2x1xf32>
      %194 = vector.broadcast %193 : vector<2x1xf32> to vector<2x512xf32>
      %195 = arith.mulf %190, %194 : vector<2x512xf32>
      %196 = vector.broadcast %176 : vector<1x512xf32> to vector<2x512xf32>
      %197 = arith.mulf %195, %196 : vector<2x512xf32>
      %198 = vector.broadcast %177 : vector<1x512xf32> to vector<2x512xf32>
      %199 = arith.addf %197, %198 : vector<2x512xf32>
      %cst_86 = arith.constant 0.000000e+00 : f32
      %200 = vector.broadcast %cst_86 : f32 to vector<2x512xf32>
      %201 = arith.maximumf %199, %200 : vector<2x512xf32>
      %c0_87 = arith.constant 0 : index
      %c0_88 = arith.constant 0 : index
      %202 = vector.load %arg16[%c0_87, %c0_88] : memref<2x512xf32, #tpu.memory_space<vmem>>, vector<2x512xf32>
      tpu.vector_store %arg16[%c0_87, %c0_88], %201 {strides = array<i32>} : memref<2x512xf32, #tpu.memory_space<vmem>>, vector<2x512xf32>,
    } else {
    }
    return
  }
  func.func @transform_0(%arg0: i32) -> (i32, i32, i32) {
    %c0_i32 = arith.constant 0 : i32
    %c0_i32_0 = arith.constant 0 : i32
    %c0_i32_1 = arith.constant 0 : i32
    %c0_i32_2 = arith.constant 0 : i32
    return %c0_i32, %c0_i32_0, %c0_i32_1 : i32, i32, i32
  }
  func.func @transform_1(%arg0: i32) -> (i32, i32, i32) {
    %c0_i32 = arith.constant 0 : i32
    %c0_i32_0 = arith.constant 0 : i32
    %c0_i32_1 = arith.constant 0 : i32
    %c0_i32_2 = arith.constant 0 : i32
    return %c0_i32, %c0_i32_0, %c0_i32_1 : i32, i32, i32
  }
  func.func @transform_2(%arg0: i32) -> (i32, i32, i32) {
    %c0_i32 = arith.constant 0 : i32
    %c0_i32_0 = arith.constant 0 : i32
    %c0_i32_1 = arith.constant 0 : i32
    return %arg0, %c0_i32, %c0_i32_0 : i32, i32, i32
  }
  func.func @transform_3(%arg0: i32) -> (i32, i32, i32) {
    %c0_i32 = arith.constant 0 : i32
    %c0_i32_0 = arith.constant 0 : i32
    %c0_i32_1 = arith.constant 0 : i32
    return %arg0, %c0_i32, %c0_i32_0 : i32, i32, i32
  }
  func.func @transform_4(%arg0: i32) -> (i32, i32, i32, i32) {
    %c0_i32 = arith.constant 0 : i32
    %c0_i32_0 = arith.constant 0 : i32
    %c0_i32_1 = arith.constant 0 : i32
    %c0_i32_2 = arith.constant 0 : i32
    return %arg0, %c0_i32, %c0_i32_0, %c0_i32_1 : i32, i32, i32, i32
  }
  func.func @transform_5(%arg0: i32) -> (i32, i32, i32) {
    %c0_i32 = arith.constant 0 : i32
    %c0_i32_0 = arith.constant 0 : i32
    %c0_i32_1 = arith.constant 0 : i32
    return %arg0, %c0_i32, %c0_i32_0 : i32, i32, i32
  }
  func.func @transform_6(%arg0: i32) -> (i32, i32, i32) {
    %c0_i32 = arith.constant 0 : i32
    %c0_i32_0 = arith.constant 0 : i32
    %c0_i32_1 = arith.constant 0 : i32
    return %arg0, %c0_i32, %c0_i32_0 : i32, i32, i32
  }
  func.func @transform_7(%arg0: i32) -> (i32, i32, i32) {
    %c0_i32 = arith.constant 0 : i32
    %c0_i32_0 = arith.constant 0 : i32
    %c0_i32_1 = arith.constant 0 : i32
    return %arg0, %c0_i32, %c0_i32_0 : i32, i32, i32
  }
  func.func @transform_8(%arg0: i32) -> (i32, i32, i32) {
    %c0_i32 = arith.constant 0 : i32
    %c0_i32_0 = arith.constant 0 : i32
    %c0_i32_1 = arith.constant 0 : i32
    return %arg0, %c0_i32, %c0_i32_0 : i32, i32, i32
  }
  func.func @transform_9(%arg0: i32) -> (i32, i32, i32) {
    %c0_i32 = arith.constant 0 : i32
    %c0_i32_0 = arith.constant 0 : i32
    %c0_i32_1 = arith.constant 0 : i32
    return %arg0, %c0_i32, %c0_i32_0 : i32, i32, i32
  }
  func.func @transform_10(%arg0: i32) -> (i32, i32, i32) {
    %c0_i32 = arith.constant 0 : i32
    %c0_i32_0 = arith.constant 0 : i32
    %c0_i32_1 = arith.constant 0 : i32
    return %arg0, %c0_i32, %c0_i32_0 : i32, i32, i32
  }
  func.func @transform_11(%arg0: i32) -> (i32, i32, i32) {
    %c0_i32 = arith.constant 0 : i32
    %c0_i32_0 = arith.constant 0 : i32
    %c0_i32_1 = arith.constant 0 : i32
    return %arg0, %c0_i32, %c0_i32_0 : i32, i32, i32
  }
  func.func @transform_12(%arg0: i32) -> (i32, i32) {
    %c0_i32 = arith.constant 0 : i32
    %c0_i32_0 = arith.constant 0 : i32
    %c0_i32_1 = arith.constant 0 : i32
    return %c0_i32, %c0_i32_0 : i32, i32
  }
  func.func @transform_13(%arg0: i32) -> (i32, i32) {
    %c0_i32 = arith.constant 0 : i32
    %c0_i32_0 = arith.constant 0 : i32
    %c0_i32_1 = arith.constant 0 : i32
    return %c0_i32, %c0_i32_0 : i32, i32
  }
  func.func @transform_14(%arg0: i32) -> (i32, i32) {
    %c0_i32 = arith.constant 0 : i32
    %c0_i32_0 = arith.constant 0 : i32
    %c0_i32_1 = arith.constant 0 : i32
    return %c0_i32, %c0_i32_0 : i32, i32
  }
  func.func @transform_15(%arg0: i32) -> (i32, i32) {
    %c0_i32 = arith.constant 0 : i32
    %c0_i32_0 = arith.constant 0 : i32
    %c0_i32_1 = arith.constant 0 : i32
    return %c0_i32, %c0_i32_0 : i32, i32
  }
}

</mosaic_0001>

<bundles_post_ra>
// kernel: text_feature_extractor_forward.1
= control target key start
LH: loop header
LB: loop body
LE: loop exit
PB: predicated region body
PF: predicated region fallthrough
CT: control target
= control target key end

     0   :  { %s2716_s0 = inlined_call_operand.vmem [shape: bf16[2,8,32], index: 0, kind: input, shape index: {}]   ;;  %s2717_s1 = inlined_call_operand.vmem [shape: f32[2,1,8], index: 1, kind: input, shape index: {}]   ;;  %s2718_s2 = inlined_call_operand.vmem [shape: bf16[2,32,96], index: 2, kind: input, shape index: {}]   ;;  %s2719_s3 = inlined_call_operand.vmem [shape: f32[2,1,96], index: 3, kind: input, shape index: {}]   ;;  %s2720_s4 = inlined_call_operand.vmem [shape: bf16[2,2,16,32], index: 4, kind: input, shape index: {}]   ;;  %s2721_s5 = inlined_call_operand.vmem [shape: f32[2,1,32], index: 5, kind: input, shape index: {}]   ;;  %s2722_s6 = inlined_call_operand.vmem [shape: f32[2,2,32], index: 6, kind: input, shape index: {}]   ;;  %s2723_s7 = inlined_call_operand.vmem [shape: bf16[2,32,64], index: 7, kind: input, shape index: {}]   ;;  %s2724_s8 = inlined_call_operand.vmem [shape: f32[2,1,64], index: 8, kind: input, shape index: {}]   ;;  %s2725_s9 = inlined_call_operand.vmem [shape: bf16[2,64,32], index: 9, kind: input, shape index: {}]   ;;  %s2726_s10 = inlined_call_operand.vmem [shape: f32[2,1,32], index: 10, kind: input, shape index: {}]   ;;  %s2727_s11 = inlined_call_operand.vmem [shape: f32[2,2,32], index: 11, kind: input, shape index: {}]   ;;  %s2728_s12 = inlined_call_operand.vmem [shape: bf16[32,512], index: 12, kind: input, shape index: {}]   ;;  %s2729_s13 = inlined_call_operand.vmem [shape: f32[1,512], index: 13, kind: input, shape index: {}]   ;;  %s2730_s14 = inlined_call_operand.vmem [shape: f32[2,512], index: 14, kind: input, shape index: {}]   ;;  %s2731_s15 = inlined_call_operand.hbm [shape: f32[2,512], index: 15, kind: output, shape index: {}]  }
   0x1   :  { %2735 = sst [smem:[#allocation7_spill]] %s2718_s2 }
   0x2   :  { %2736 = sst [smem:[#allocation8_spill]] %s2720_s4 }
   0x3   :  { %2737 = sst [smem:[#allocation9_spill]] %s2722_s6 }
   0x4   :  { %2738 = sst [smem:[#allocation10_spill]] %s2728_s12 }
   0x5   :  { %2739 = sst [smem:[#allocation11_spill]] %s2729_s13 }
   0x6   :  { %2740 = sst [smem:[#allocation12_spill]] %s2730_s14 }
   0x7   :  { %2741 = sst [smem:[#allocation13_spill]] %s2731_s15 }
   0x8   :  { %20 = vsyncpa [#allocation4], 0  ;;  %s2405_s18 = smov 0  }
   0x9 LB: > { %2742 = sst [smem:[#allocation6_spill]] %s2313_s18  ;;  %s2411_s19 = sadd.s32 4294967295, %s2313_s18   ;;  %s2313_s18 = sphi %s2405_s18, %s26_s18  }
   0xa   : > { %p2013_p0 = scmp.ge.s32.totalorder %s2313_s18, 1  ;;  %p513_p1 = scmp.lt.s32.totalorder %s2313_s18, 3 }
   0xc   : > { %p514_p2 = pnand %p2013_p0, %p513_p1 }
   0xd   : > { %p591_p3 = scmp.lt.s32.totalorder (!%p514_p2), %s2411_s19, 1  ;;  %s2743_s2 = sld [smem:[#allocation7_spill]] (!%p514_p2) }
   0xe   : > { %517 = sbr.rel (%p514_p2) target bundleno = 3261 (0xcbd), region = 80  ;;  %s2744_s4 = sld [smem:[#allocation8_spill]] (!%p514_p2) }
   0xf   : > { %s2745_s6 = sld [smem:[#allocation9_spill]] (!%p514_p2)  ;;  %p2024_p4 = scmp.ne.s32.totalorder (!%p514_p2), %s2411_s19, 0 }
  0x15   : > { %s2417_s20 = scalar_select %p591_p3, %s2411_s19, 1 }
  0x16   : > { %635 = sbr.rel (%p2024_p4) target bundleno = 29 (0x1d), region = 84  ;;  %v636_v0 = vld [vmem:[%s2716_s0] sm:$0xf] (!%p2024_p4)  ;;  %vm638_vm0 = vcmask (!%p2024_p4), 257024   ;;  %v637_v1 = vld [vmem:[%s2716_s0 + $0x4] sm:$0xf] (!%p2024_p4) }
  0x17   : > { %s2074_s21 = sshll.u32 %s2417_s20, 4  ;;  %s2018_s15 = sshll.u32 %s2417_s20, 1  ;;  %639 = vst.msk [vmem:[#allocation2] sm:$0xf] (!%p2024_p4), %vm638_vm0, %v636_v0  ;;  %640 = vst.msk [vmem:[#allocation2 + $0x4] sm:$0xf] (!%p2024_p4), %vm638_vm0, %v637_v1 }
  0x18   : > { %s595_s27 = scalar_lea.vmem %s2743_s2, %s2074_s21  ;;  %s2430_s30 = scalar_lea.vmem %s2744_s4, %s2074_s21 }
  0x19   : > { %s2440_s12 = scalar_lea.vmem %s2745_s6, %s2018_s15  ;;  %s2445_s25 = scalar_lea.vmem %s2723_s7, %s2074_s21 }
  0x1a   : > { %s618_s28 = scalar_lea.vmem %s2724_s8, %s2417_s20  ;;  %s2077_s29 = sshll.u32 %s2417_s20, 5 }
  0x1b   : > { %s2455_s16 = scalar_lea.vmem %s2725_s9, %s2077_s29  ;;  %s626_s13 = scalar_lea.vmem %s2726_s10, %s2417_s20 }
  0x1c   : > { %s2464_s22 = scalar_lea.vmem %s2727_s11, %s2018_s15 }
  0x1d PF: > { %v2221_v2 = vld [vmem:[%s595_s27] sm:$0xff]   ;;  %v2315_v3 = vmov 0.0   ;;  %v2222_v4 = vld [vmem:[%s595_s27 + $0x8] sm:$0xff]   ;;  %vm2316_vm1 = vmmov 0   ;;  %vm673_vm2 = vcmask 261120   ;;  %s2746_s18 = scalar_lea.vmem %s2719_s3, %s2417_s20  ;;  %s2317_s27 = smov 96  }
  0x1e   : > { %2109 = vmatprep.subr.bf16.mxu1 %v2315_v3  ;;  %2123 = vmatprep.subr.bf16.mxu0 %v2315_v3  ;;  %v2477_v5 = vld [vmem:[#allocation2] sm:$0xff]   ;;  %s2318_s23 = smov 64   ;;  %s2319_s26 = smov 80   ;;  %vm737_vm3 = vcmask 130048   ;;  %vm859_vm4 = vcmask 1043456   ;;  %vm833_vm5 = vcmask 64512  }
  0x1f   : > { %2110 = vmatpush3.bf16.msra.mxu1 %v2221_v2  ;;  %2113 = vmatprep.mubr.msk.bf16.mxu1 %vm2316_vm1, %v2315_v3  ;;  %v2025_v6 = vld [vmem:[%s2746_s18] ss:$0 sm:$0xff]  ;;  %s2320_s29 = smov 112   ;;  %v2031_v26 = vld [vmem:[%s2717_s1 + $0x1] ss:$0 sm:$0xff]  ;;  %s2321_s2 = smov 48  }
  0x20   : > { %2111 = vmatprep.subr.bf16.mxu1 %v2315_v3  ;;  %2125 = vmatprep.mubr.msk.bf16.mxu0 %vm2316_vm1, %v2315_v3  ;;  %v2030_v21 = vld [vmem:[%s2717_s1] ss:$0 sm:$0xff]  ;;  %s2747_s6 = scalar_lea.vmem %s2721_s5, %s2417_s20  ;;  %vm1459_vm6 = vcmask 523264   ;;  %vm1547_vm7 = vcmask 257024   ;;  %p2057_p5 = scmp.ne.s32.totalorder %s2411_s19, 1 }
  0x21   : > { %vm1595_vm8 = vcmask (!%p2057_p5), 1041409   ;;  %vm1724_vm9 = vcmask (!%p2057_p5), 1041408  }
  0x23   : > { %2112 = vmatpush3.bf16.msra.mxu1 %v2222_v4 }
  0x24   : > { %2117 = vmatprep.subr.bf16.mxu1 %v2315_v3 }
  0x26   : > { %2114 = vmatmul.mubr.msk.bf16.vlgmr.msra.gmra.mrb[0].mxu1 %vm673_vm2, %v2477_v5 }
  0x27   : > { %2119 = vmatprep.mubr.msk.bf16.mxu1 %vm2316_vm1, %v2315_v3 }
  0xf9   : > { %v711_v7 = vpop.f32.mrb[0].mxu1 }
  0xfa   : > { %v712_v8 = vadd.f32 %v2025_v6, %v711_v7  ;;  %v2115_v9 = vpop.f32.mrb[1].mxu1 }
  0xfb   : > { %v714_v10 = vpop.f32.mrb[2].mxu1 }
  0xfc   : > { %v2492_v11 = vpack.c.bf16 %v712_v8, %v712_v8  ;;  %v715_v12 = vadd.f32 %v2025_v6, %v714_v10  ;;  %v2116_v13 = vpop.f32.mrb[3].mxu1 }
  0xfe   : > { %735 = vrot.lane.b32.xlu0 %v2492_v11, %s2317_s27  ;;  %v2495_v14 = vpack.c.bf16 %v715_v12, %v715_v12 }
 0x102   : > { %785 = vrot.lane.b32.xlu0 %v2495_v14, %s2317_s27 }
 0x106   : > { %854 = vrot.lane.b32.xlu0 %v2492_v11, %s2318_s23 }
 0x10a   : > { %960 = vrot.lane.b32.xlu0 %v2492_v11, %s2319_s26 }
 0x10e   : > { %1010 = vrot.lane.b32.xlu0 %v2495_v14, %s2319_s26 }
 0x112   : > { %958 = vrot.lane.b32.xlu0 %v2492_v11, %s2320_s29 }
 0x116   : > { %1008 = vrot.lane.b32.xlu0 %v2495_v14, %s2320_s29 }
 0x170   : > { %v736_v15 = vpop.permute.xlu0 %735 }
 0x171   : > { %v742_v16 = vsel %vm737_vm3, %v736_v15, 0 }
 0x172   : > { %2118 = vmatpush3.bf16.xpose.msra.mxu1 %v742_v16 }
 0x173   : > { %2129 = vmatprep.subr.bf16.mxu1 %v2315_v3 }
 0x174   : > { %v786_v17 = vpop.permute.xlu0 %785 }
 0x175   : > { %v791_v18 = vsel %vm737_vm3, %v786_v17, 0 }
 0x176   : > { %2124 = vmatpush3.bf16.xpose.msra.mxu0 %v791_v18 }
 0x177   : > { %2135 = vmatprep.subr.bf16.mxu0 %v2315_v3 }
 0x178   : > { %v855_v19 = vpop.permute.xlu0 %854 }
 0x179   : > { %v861_v20 = vsel %vm859_vm4, %v855_v19, 0  ;;  %2120 = vmatmul.mubr.msk.bf16.vlgmr.msra.gmra.mrb[4].mxu1 %vm737_vm3, %v2492_v11 }
 0x17a   : > { %2130 = vmatpush3.bf16.msra.mxu1 %v861_v20  ;;  %2131 = vmatprep.mubr.msk.bf16.mxu1 %vm2316_vm1, %v2315_v3 }
 0x17b   : > { %2141 = vmatprep.subr.bf16.mxu1 %v2315_v3 }
 0x17c   : > { %v961_v43 = vpop.permute.xlu0 %960 }
 0x17d   : > { %2126 = vmatmul.mubr.msk.bf16.vlgmr.msra.gmra.mrb[0].mxu0 %vm737_vm3, %v2495_v14  ;;  %v966_v47 = vsel %vm737_vm3, %v961_v43, 0 }
 0x17e   : > { %2137 = vmatprep.mubr.msk.bf16.mxu0 %vm2316_vm1, %v2315_v3 }
 0x180   : > { %v1011_v46 = vpop.permute.xlu0 %1010 }
 0x181   : > { %v1016_v50 = vsel %vm737_vm3, %v1011_v46, 0 }
 0x184   : > { %v959_v51 = vpop.permute.xlu0 %958 }
 0x188   : > { %v1009_v52 = vpop.permute.xlu0 %1008 }
 0x24c   : > { %v778_v22 = vpop.f32.mrb[4].mxu1 }
 0x24d   : > { %v779_v23 = vadd.f32 %v2030_v21, %v778_v22  ;;  %v2121_v24 = vpop.f32.mrb[5].mxu1 }
 0x24e   : > { %v781_v25 = vpop.f32.mrb[6].mxu1 }
 0x24f   : > { %v2122_v27 = vpop.f32.mrb[7].mxu1  ;;  %v834_v28 = vsel %vm833_vm5, %v779_v23, -inf }
 0x250   : > { %v827_v29 = vpop.f32.mrb[0].mxu0  ;;  %835 = vmax.xlane.f32.xlu1 %v834_v28  ;;  %v2224_v27 = vld [vmem:[%s2430_s30] sm:$0xff]  }
 0x251   : > { %v828_v30 = vadd.f32 %v2031_v26, %v827_v29  ;;  %v2127_v31 = vpop.f32.mrb[1].mxu0 }
 0x252   : > { %v830_v32 = vpop.f32.mrb[2].mxu0 }
 0x253   : > { %v2128_v33 = vpop.f32.mrb[3].mxu0  ;;  %v837_v34 = vsel %vm833_vm5, %v828_v30, -inf }
 0x254   : > { %838 = vmax.xlane.f32.xlu1 %v837_v34 }
 0x265   : > { %903 = vrot.lane.b32.xlu1 %v2495_v14, %s2318_s23 }
 0x2dd   : > { %v836_v35 = vpop.xlane.xlu1 %835 }
 0x2de   : > { %v840_v36 = vsub.f32 %v779_v23, %v836_v35 }
 0x2e0   : > { %v842_v37 = vmul.f32 1.442695, %v840_v36 }
 0x2e1   : > { %v839_v38 = vpop.xlane.xlu1 %838 }
 0x2e2   : > { %2233 = vpow2.f32 %v842_v37  ;;  %v841_v39 = vsub.f32 %v828_v30, %v839_v38  ;;  %v2225_v37 = vld [vmem:[%s2430_s30 + $0x8] sm:$0xff]  }
 0x2e4   : > { %v844_v40 = vmul.f32 1.442695, %v841_v39 }
 0x2e5   : > { %v904_v41 = vpop.permute.xlu1 %903 }
 0x2e6   : > { %2235 = vpow2.f32 %v844_v40  ;;  %v909_v42 = vsel %vm859_vm4, %v904_v41, 0 }
 0x2e7   : > { %2136 = vmatpush3.bf16.msra.mxu0 %v909_v42 }
 0x2e8   : > { %2147 = vmatprep.subr.bf16.mxu0 %v2315_v3 }
 0x2ec   : > { %v2234_v44 = vpop.eup %2233 }
 0x2ed   : > { %v852_v45 = vpack.c.bf16 %v2234_v44, %v2234_v44  ;;  %v846_v12 = vsel %vm833_vm5, %v2234_v44, 0.0 }
 0x2ef   : > { %2132 = vmatmul.mubr.msk.bf16.vlgmr.msra.gmra.mrb[8].mxu1 %vm833_vm5, %v852_v45 }
 0x2f0   : > { %v2236_v48 = vpop.eup %2235  ;;  %2142 = vmatpush3.bf16.xpose.msra.mxu1 %v966_v47  ;;  %2143 = vmatprep.mubr.msk.bf16.mxu1 %vm2316_vm1, %v2315_v3 }
 0x2f1   : > { %v853_v49 = vpack.c.bf16 %v2236_v48, %v2236_v48  ;;  %2153 = vmatprep.subr.bf16.mxu1 %v2315_v3  ;;  %v849_v13 = vsel %vm833_vm5, %v2236_v48, 0.0 }
 0x2f3   : > { %2138 = vmatmul.mubr.msk.bf16.vlgmr.msra.gmra.mrb[4].mxu0 %vm833_vm5, %v853_v49 }
 0x2f4   : > { %2148 = vmatpush3.bf16.xpose.msra.mxu0 %v1016_v50  ;;  %2149 = vmatprep.mubr.msk.bf16.mxu0 %vm2316_vm1, %v2315_v3 }
 0x2f5   : > { %2159 = vmatprep.subr.bf16.mxu0 %v2315_v3 }
 0x2f7   : > { %2144 = vmatmul.mubr.msk.bf16.vlgmr.msra.gmra.mrb[12].mxu1 %vm737_vm3, %v959_v51 }
 0x2f8   : > { %2155 = vmatprep.mubr.msk.bf16.mxu1 %vm2316_vm1, %v2315_v3 }
 0x2fb   : > { %2150 = vmatmul.mubr.msk.bf16.vlgmr.msra.gmra.mrb[8].mxu0 %vm737_vm3, %v1009_v52 }
 0x2fc   : > { %2161 = vmatprep.mubr.msk.bf16.mxu0 %vm2316_vm1, %v2315_v3 }
 0x3c2   : > { %v2546_v53 = vpop.f32.mrb[8].mxu1 }
 0x3c3   : > { %v2133_v54 = vpop.f32.mrb[9].mxu1 }
 0x3c4   : > { %v900_v55 = vpop.f32.mrb[10].mxu1 }
 0x3c5   : > { %v2134_v56 = vpop.f32.mrb[11].mxu1 }
 0x3c6   : > { %v2548_v57 = vpop.f32.mrb[4].mxu0 }
 0x3c7   : > { %v2139_v58 = vpop.f32.mrb[5].mxu0 }
 0x3c8   : > { %v948_v59 = vpop.f32.mrb[6].mxu0  ;;  %v2046_v58 = vld [vmem:[%s2747_s6] ss:$0 sm:$0xff] }
 0x3c9   : > { %v2140_v60 = vpop.f32.mrb[7].mxu0 }
 0x3ca   : > { %v1002_v61 = vpop.f32.mrb[12].mxu1 }
 0x3cb   : > { %v1003_v62 = vadd.f32 %v2030_v21, %v1002_v61  ;;  %v2145_v63 = vpop.f32.mrb[13].mxu1  ;;  %v643_v61 = vunpack.c.l.bf16 %v2477_v5 }
 0x3cc   : > { %v1005_v0 = vpop.f32.mrb[14].mxu1 }
 0x3cd   : > { %v2146_v1 = vpop.f32.mrb[15].mxu1  ;;  %v1058_v2 = vsel %vm833_vm5, %v1003_v62, -inf }
 0x3ce   : > { %v1052_v4 = vpop.f32.mrb[8].mxu0  ;;  %1059 = vmax.xlane.f32.xlu1 %v1058_v2  ;;  %v644_v2 = vunpack.c.h.bf16 %v2477_v5 }
 0x3cf   : > { %v1053_v6 = vadd.f32 %v2031_v26, %v1052_v4  ;;  %v2151_v7 = vpop.f32.mrb[9].mxu0 }
 0x3d0   : > { %v1055_v8 = vpop.f32.mrb[10].mxu0 }
 0x3d1   : > { %v2152_v9 = vpop.f32.mrb[11].mxu0  ;;  %v1061_v10 = vsel %vm833_vm5, %v1053_v6, -inf }
 0x3d2   : > { %1062 = vmax.xlane.f32.xlu0 %v1061_v10 }
 0x3df   : > { %1126 = vrot.lane.b32.xlu1 %v2495_v14, %s2321_s2 }
 0x3e8   : > { %1078 = vrot.lane.b32.xlu0 %v2492_v11, %s2321_s2 }
 0x403   : > { %847 = vadd.xlane.f32.xlu1 %v846_v12 }
 0x407   : > { %850 = vadd.xlane.f32.xlu0 %v849_v13 }
 0x45b   : > { %v1060_v15 = vpop.xlane.xlu1 %1059 }
 0x45c   : > { %v1064_v16 = vsub.f32 %v1003_v62, %v1060_v15 }
 0x45e   : > { %v1066_v17 = vmul.f32 1.442695, %v1064_v16 }
 0x45f   : > { %v1063_v18 = vpop.xlane.xlu0 %1062  ;;  %v1127_v19 = vpop.permute.xlu1 %1126 }
 0x460   : > { %2237 = vpow2.f32 %v1066_v17  ;;  %v1065_v20 = vsub.f32 %v1053_v6, %v1063_v18  ;;  %v1132_v21 = vsel %vm859_vm4, %v1127_v19, 0 }
 0x461   : > { %2160 = vmatpush3.bf16.msra.mxu0 %v1132_v21  ;;  %v2226_v21 = vld [vmem:[%s2445_s25] sm:$0xff]  }
 0x462   : > { %v1068_v14 = vmul.f32 1.442695, %v1065_v20  ;;  %2171 = vmatprep.subr.bf16.mxu0 %v2315_v3 }
 0x463   : > { %v1079_v11 = vpop.permute.xlu0 %1078 }
 0x464   : > { %2239 = vpow2.f32 %v1068_v14  ;;  %v1084_v22 = vsel %vm859_vm4, %v1079_v11, 0  ;;  %v2227_v14 = vld [vmem:[%s2445_s25 + $0x8] sm:$0xff]  }
 0x465   : > { %2154 = vmatpush3.bf16.msra.mxu1 %v1084_v22 }
 0x466   : > { %2165 = vmatprep.subr.bf16.mxu1 %v2315_v3 }
 0x46a   : > { %v2238_v23 = vpop.eup %2237 }
 0x46b   : > { %v1070_v24 = vsel %vm833_vm5, %v2238_v23, 0.0  ;;  %v1076_v25 = vpack.c.bf16 %v2238_v23, %v2238_v23  ;;  %v1321_v23 = vlaneseq }
 0x46c   : > { %1071 = vadd.xlane.f32.xlu0 %v1070_v24 }
 0x46d   : > { %2156 = vmatmul.mubr.msk.bf16.vlgmr.msra.gmra.mrb[16].mxu1 %vm833_vm5, %v1076_v25 }
 0x46e   : > { %v2240_v26 = vpop.eup %2239  ;;  %2167 = vmatprep.mubr.msk.bf16.mxu1 %vm2316_vm1, %v2315_v3  ;;  %2166 = vmatpush3.bf16.msra.mxu1 %v2225_v37 }
 0x46f   : > { %v1073_v28 = vsel %vm833_vm5, %v2240_v26, 0.0  ;;  %v1077_v29 = vpack.c.bf16 %v2240_v26, %v2240_v26  ;;  %2177 = vmatprep.subr.bf16.mxu1 %v2315_v3 }
 0x470   : > { %1074 = vadd.xlane.f32.xlu1 %v1073_v28  ;;  %v2594_v28 = vshrl.u32 %v1321_v23, 7 }
 0x471   : > { %2162 = vmatmul.mubr.msk.bf16.vlgmr.msra.gmra.mrb[12].mxu0 %vm833_vm5, %v1077_v29 }
 0x472   : > { %2172 = vmatpush3.bf16.msra.mxu0 %v2224_v27  ;;  %2173 = vmatprep.mubr.msk.bf16.mxu0 %vm2316_vm1, %v2315_v3  ;;  %v2597_v29 = vsub.s32 0, %v2594_v28 }
 0x473   : > { %2185 = vmatprep.subr.bf16.mxu0 %v2315_v3 }
 0x490   : > { %v848_v30 = vpop.xlane.xlu1 %847 }
 0x491   : > { %2241 = vrcp.f32 %v848_v30  ;;  %v1291_v30 = vld [vmem:[%s2440_s12] sm:$0x3] }
 0x494   : > { %v851_v31 = vpop.xlane.xlu0 %850 }
 0x495   : > { %2243 = vrcp.f32 %v851_v31  ;;  %v1324_v31 = vrot.slane %v1291_v30, %v2597_v29 }
 0x49b   : > { %v2242_v32 = vpop.eup %2241 }
 0x49c   : > { %v953_v34 = vmul.f32 %v2242_v32, %v2546_v53  ;;  %v2602_v32 = vsub.s32 1, %v2594_v28 }
 0x49f   : > { %v2244_v33 = vpop.eup %2243 }
 0x4a0   : > { %v954_v35 = vmul.f32 %v2244_v33, %v2548_v57 }
 0x4a2   : > { %v955_v36 = vpack.c.bf16 %v954_v35, %v953_v34 }
 0x4a4   : > { %2174 = vmatmul.mubr.msk.bf16.vlgmr.msra.gmra.mrb[16].mxu0 %vm737_vm3, %v955_v36 }
 0x4a5   : > { %2193 = vmatprep.mubr.msk.bf16.mxu0 %vm2316_vm1, %v2315_v3 }
 0x4f9   : > { %v1072_v38 = vpop.xlane.xlu0 %1071 }
 0x4fa   : > { %2245 = vrcp.f32 %v1072_v38  ;;  %v1330_v38 = vrot.slane %v1291_v30, %v2602_v32 }
 0x4fd   : > { %v1075_v39 = vpop.xlane.xlu1 %1074 }
 0x4fe   : > { %2247 = vrcp.f32 %v1075_v39 }
 0x504   : > { %v2246_v43 = vpop.eup %2245 }
 0x508   : > { %v2248_v45 = vpop.eup %2247 }
 0x540   : > { %v1120_v40 = vpop.f32.mrb[16].mxu1 }
 0x541   : > { %v2157_v41 = vpop.f32.mrb[17].mxu1  ;;  %v1176_v47 = vmul.f32 %v2246_v43, %v1120_v40  ;;  %v2228_v43 = vld [vmem:[%s2455_s16] sm:$0xff]  }
 0x542   : > { %v1123_v42 = vpop.f32.mrb[18].mxu1  ;;  %2186 = vmatpush3.bf16.msra.mxu0 %v2228_v43 }
 0x543   : > { %v2158_v44 = vpop.f32.mrb[19].mxu1  ;;  %2187 = vmatprep.subr.bf16.mxu0 %v2315_v3 }
 0x544   : > { %v1168_v46 = vpop.f32.mrb[12].mxu0  ;;  %v2229_v44 = vld [vmem:[%s2455_s16 + $0x8] sm:$0xff]  }
 0x545   : > { %v1177_v48 = vmul.f32 %v2248_v45, %v1168_v46  ;;  %v2163_v49 = vpop.f32.mrb[13].mxu0  ;;  %v2230_v45 = vld [vmem:[%s2455_s16 + $0x10] sm:$0xff]   ;;  %v2231_v46 = vld [vmem:[%s2455_s16 + $0x18] sm:$0xff]  }
 0x546   : > { %v1171_v50 = vpop.f32.mrb[14].mxu0  ;;  %2188 = vmatpush3.bf16.msra.mxu0 %v2229_v44 }
 0x547   : > { %v1178_v51 = vpack.c.bf16 %v1177_v48, %v1176_v47  ;;  %v2164_v52 = vpop.f32.mrb[15].mxu0  ;;  %2189 = vmatprep.subr.bf16.mxu0 %v2315_v3  ;;  %v2047_v47 = vld [vmem:[%s618_s28] ss:$0 sm:$0xff]  ;;  %s2749_s28 = sld [smem:[#allocation11_spill]] (!%p2057_p5) }
 0x549   : > { %2168 = vmatmul.mubr.msk.bf16.vlgmr.msra.gmra.mrb[20].mxu1 %vm737_vm3, %v1178_v51 }
 0x54a   : > { %2181 = vmatprep.mubr.msk.bf16.mxu1 %vm2316_vm1, %v2315_v3  ;;  %2178 = vmatpush3.bf16.msra.mxu1 %v2226_v21 }
 0x54b   : > { %2179 = vmatprep.subr.bf16.mxu1 %v2315_v3  ;;  %2190 = vmatpush3.bf16.msra.mxu0 %v2230_v45 }
 0x54c   : > { %2191 = vmatprep.subr.bf16.mxu0 %v2315_v3 }
 0x54e   : > { %2180 = vmatpush3.bf16.msra.mxu1 %v2227_v14 }
 0x54f   : > { %2192 = vmatpush3.bf16.msra.mxu0 %v2231_v46 }
 0x577   : > { %v1275_v53 = vpop.f32.mrb[16].mxu0 }
 0x578   : > { %v2175_v54 = vpop.f32.mrb[17].mxu0 }
 0x579   : > { %v1278_v55 = vpop.f32.mrb[18].mxu0 }
 0x57a   : > { %v2176_v56 = vpop.f32.mrb[19].mxu0 }
 0x61c   : > { %v1225_v57 = vpop.f32.mrb[20].mxu1 }
 0x61d   : > { %v1276_v59 = vadd.f32 %v1275_v53, %v1225_v57  ;;  %v2169_v60 = vpop.f32.mrb[21].mxu1 }
 0x61e   : > { %v1228_v62 = vpop.f32.mrb[22].mxu1 }
 0x61f   : > { %v1289_v63 = vadd.f32 %v2046_v58, %v1276_v59  ;;  %v1279_v0 = vadd.f32 %v1278_v55, %v1228_v62  ;;  %v2170_v1 = vpop.f32.mrb[23].mxu1 }
 0x621   : > { %v1290_v4 = vadd.f32 %v2046_v58, %v1279_v0  ;;  %v1292_v6 = vadd.f32 %v1289_v63, %v643_v61 }
 0x623   : > { %v1294_v7 = vsel %vm673_vm2, %v1292_v6, 0.0  ;;  %v1293_v8 = vadd.f32 %v1290_v4, %v644_v2 }
 0x624   : > { %1295 = vadd.xlane.f32.xlu0 %v1294_v7 }
 0x625   : > { %v1297_v9 = vsel %vm673_vm2, %v1293_v8, 0.0 }
 0x626   : > { %1298 = vadd.xlane.f32.xlu1 %v1297_v9 }
 0x6b1   : > { %v1296_v10 = vpop.xlane.xlu0 %1295 }
 0x6b2   : > { %v1301_v12 = vmul.f32 0.03125, %v1296_v10  ;;  %v2051_v10 = vld [vmem:[%s626_s13] ss:$0 sm:$0xff]  ;;  %s2750_s13 = sld [smem:[#allocation12_spill]] (!%p2057_p5) }
 0x6b3   : > { %v1299_v13 = vpop.xlane.xlu1 %1298 }
 0x6b4   : > { %v1303_v15 = vsub.f32 %v1292_v6, %v1301_v12  ;;  %v1302_v16 = vmul.f32 0.03125, %v1299_v13 }
 0x6b6   : > { %v1304_v17 = vsub.f32 %v1293_v8, %v1302_v16  ;;  %v1305_v18 = vmul.f32 %v1303_v15, %v1303_v15 }
 0x6b8   : > { %v1307_v5 = vsel %vm673_vm2, %v1305_v18, 0.0  ;;  %v1306_v19 = vmul.f32 %v1304_v17, %v1304_v17 }
 0x6b9   : > { %1308 = vadd.xlane.f32.xlu0 %v1307_v5 }
 0x6ba   : > { %v1310_v20 = vsel %vm673_vm2, %v1306_v19, 0.0 }
 0x6bb   : > { %1311 = vadd.xlane.f32.xlu1 %v1310_v20 }
 0x746   : > { %v1309_v11 = vpop.xlane.xlu0 %1308 }
 0x747   : > { %v1313_v22 = vmul.f32 0.03125, %v1309_v11 }
 0x748   : > { %v1312_v24 = vpop.xlane.xlu1 %1311 }
 0x749   : > { %v1315_v25 = vadd.f32 1e-12, %v1313_v22  ;;  %v1314_v26 = vmul.f32 0.03125, %v1312_v24 }
 0x74b   : > { %2249 = vrsqrt.f32 %v1315_v25  ;;  %v1316_v27 = vadd.f32 1e-12, %v1314_v26 }
 0x74d   : > { %2251 = vrsqrt.f32 %v1316_v27 }
 0x755   : > { %v2250_v33 = vpop.eup %2249 }
 0x756   : > { %v1319_v34 = vmul.f32 %v2250_v33, %v1303_v15 }
 0x757   : > { %v2252_v35 = vpop.eup %2251 }
 0x758   : > { %v1325_v36 = vmul.f32 %v1324_v31, %v1319_v34  ;;  %v1320_v37 = vmul.f32 %v2252_v35, %v1304_v17 }
 0x75a   : > { %v1326_v39 = vmul.f32 %v1324_v31, %v1320_v37  ;;  %v1331_v40 = vadd.f32 %v1330_v38, %v1325_v36 }
 0x75c   : > { %v1332_v41 = vadd.f32 %v1330_v38, %v1326_v39  ;;  %v1504_v39 = vld [vmem:[%s2464_s22] sm:$0x3]  ;;  %s2748_s22 = sld [smem:[#allocation10_spill]] (!%p2057_p5) }
 0x75e   : > { %v1333_v42 = vpack.c.bf16 %v1332_v41, %v1331_v40 }
 0x760   : > { %2182 = vmatmul.mubr.msk.bf16.vlgmr.msra.gmra.mrb[24].mxu1 %vm673_vm2, %v1333_v42  ;;  %v1542_v42 = vrot.slane %v1504_v39, %v2602_v32 }
 0x833   : > { %v1394_v48 = vpop.f32.mrb[24].mxu1 }
 0x834   : > { %v1395_v49 = vadd.f32 %v2047_v47, %v1394_v48  ;;  %v2183_v50 = vpop.f32.mrb[25].mxu1 }
 0x835   : > { %v1397_v51 = vpop.f32.mrb[26].mxu1 }
 0x836   : > { %v1401_v52 = vmul.f32 %v1395_v49, %v1395_v49  ;;  %v1398_v53 = vadd.f32 %v2047_v47, %v1397_v51  ;;  %v2184_v54 = vpop.f32.mrb[27].mxu1 }
 0x837   : > { %v2322_v54 = vmov (!%p2057_p5), 0  }
 0x838   : > { %v1403_v55 = vmul.f32 %v1401_v52, %v1395_v49  ;;  %v1402_v56 = vmul.f32 %v1398_v53, %v1398_v53  ;;  %v2261_v52 = vld [vmem:[%s2748_s22 + $0x4] ss:$16 sps:$4 sm:$0xff] (!%p2057_p5)   ;;  %1714 = vmatprep.mubr.bf16.mxu1 (!%p2057_p5), %v2322_v54 }
 0x839   : > { %1641 = vmatprep.subr.bf16.mxu0 (!%p2057_p5), %v2261_v52 }
 0x83a   : > { %v1405_v57 = vmul.f32 0.044715, %v1403_v55  ;;  %v1404_v58 = vmul.f32 %v1402_v56, %v1398_v53  ;;  %v2265_v55 = vld [vmem:[%s2748_s22] ss:$16 sps:$4 sm:$0xff] (!%p2057_p5)   ;;  %v2266_v56 = vld [vmem:[%s2748_s22 + $0x8] ss:$16 sps:$4 sm:$0xff] (!%p2057_p5)  }
 0x83c   : > { %v1407_v59 = vadd.f32 %v1405_v57, %v1395_v49  ;;  %v1406_v3 = vmul.f32 0.044715, %v1404_v58  ;;  %v2267_v57 = vld [vmem:[%s2748_s22 + $0x24] ss:$16 sps:$4 sm:$0xff] (!%p2057_p5)   ;;  %v2269_v58 = vld [vmem:[%s2748_s22 + $0x2c] ss:$16 sps:$4 sm:$0xff] (!%p2057_p5)  }
 0x83e   : > { %v1409_v60 = vmul.f32 0.7978846, %v1407_v59  ;;  %v1408_v61 = vadd.f32 %v1406_v3, %v1398_v53  ;;  %v2271_v59 = vld [vmem:[%s2748_s22 + $0x20] ss:$16 sps:$4 sm:$0xff] (!%p2057_p5)   ;;  %v2272_v3 = vld [vmem:[%s2748_s22 + $0x28] ss:$16 sps:$4 sm:$0xff] (!%p2057_p5)  }
 0x840   : > { %2253 = vtanh.f32 %v1409_v60  ;;  %v1410_v62 = vmul.f32 0.7978846, %v1408_v61 }
 0x842   : > { %2255 = vtanh.f32 %v1410_v62 }
 0x84a   : > { %v2254_v63 = vpop.eup %2253 }
 0x84b   : > { %v1413_v0 = vadd.f32 1.0, %v2254_v63 }
 0x84c   : > { %v2256_v1 = vpop.eup %2255 }
 0x84d   : > { %v1415_v2 = vmul.f32 0.5, %v1413_v0  ;;  %v1414_v4 = vadd.f32 1.0, %v2256_v1 }
 0x84f   : > { %v1416_v6 = vmul.f32 0.5, %v1414_v4  ;;  %v1417_v7 = vmul.f32 %v1415_v2, %v1395_v49  ;;  %v1576_v4 = vsub.s32 (!%p2057_p5), 2, %v2594_v28 }
 0x851   : > { %v1418_v8 = vmul.f32 %v1416_v6, %v1398_v53  ;;  %v2263_v53 = vld [vmem:[%s2748_s22 + $0xc] ss:$16 sps:$4 sm:$0xff] (!%p2057_p5)   ;;  %v1564_v6 = vld [vmem:[%s2749_s28] sm:$0xf] (!%p2057_p5) }
 0x852   : > { %1682 = vmatprep.subr.bf16.mxu1 (!%p2057_p5), %v2263_v53  ;;  %v1723_v53 = vld [vmem:[%s2750_s13] sm:$0xff] (!%p2057_p5) }
 0x853   : > { %v1419_v9 = vpack.c.bf16 %v1418_v8, %v1417_v7  ;;  %1683 = vmatpush1.bf16.msra.mxu1 (!%p2057_p5), %v2266_v56  ;;  %v1580_v7 = vsub.s32 (!%p2057_p5), 3, %v2594_v28  ;;  %v1569_v8 = vrot.slane (!%p2057_p5), %v1564_v6, %v2597_v29  ;;  %v1811_v56 = vsub.s32 (!%p2057_p5), 5, %v2594_v28 }
 0x854   : > { %1684 = vmatprep.subr.bf16.mxu1 (!%p2057_p5), %v2269_v58  ;;  %v1764_v58 = vrot.slane (!%p2057_p5), %v1723_v53, %v2597_v29 }
 0x855   : > { %2194 = vmatmul.mubr.msk.bf16.vlgmr.msra.gmra.mrb[20].mxu0 %vm1459_vm6, %v1419_v9  ;;  %v1577_v9 = vrot.slane (!%p2057_p5), %v1564_v6, %v1576_v4 }
 0x856   : > { %1673 = vmatprep.mubr.bf16.mxu0 (!%p2057_p5), %v2322_v54  ;;  %1642 = vmatpush1.bf16.msra.mxu0 (!%p2057_p5), %v2265_v55  ;;  %v1771_v54 = vsub.s32 (!%p2057_p5), 4, %v2594_v28  ;;  %v1775_v55 = vsub.s32 (!%p2057_p5), 6, %v2594_v28 }
 0x857   : > { %1643 = vmatprep.subr.bf16.mxu0 (!%p2057_p5), %v2267_v57  ;;  %1685 = vmatpush1.bf16.msra.mxu1 (!%p2057_p5), %v2272_v3  ;;  %v1815_v57 = vsub.s32 (!%p2057_p5), 7, %v2594_v28 }
 0x858   : > { %v1772_v3 = vrot.slane (!%p2057_p5), %v1723_v53, %v1771_v54 }
 0x85a   : > { %1644 = vmatpush1.bf16.msra.mxu0 (!%p2057_p5), %v2271_v59  ;;  %v1768_v59 = vrot.slane (!%p2057_p5), %v1723_v53, %v1576_v4 }
 0x928   : > { %v1497_v12 = vpop.f32.mrb[20].mxu0 }
 0x929   : > { %v1498_v13 = vadd.f32 %v2051_v10, %v1497_v12  ;;  %v2195_v15 = vpop.f32.mrb[21].mxu0 }
 0x92a   : > { %v1500_v16 = vpop.f32.mrb[22].mxu0  ;;  %v1581_v15 = vrot.slane (!%p2057_p5), %v1564_v6, %v1580_v7 }
 0x92b   : > { %v1501_v17 = vadd.f32 %v2051_v10, %v1500_v16  ;;  %v2196_v18 = vpop.f32.mrb[23].mxu0  ;;  %v1505_v5 = vadd.f32 %v1498_v13, %v1331_v40  ;;  %v1536_v40 = vrot.slane %v1504_v39, %v2597_v29  ;;  %v1573_v10 = vrot.slane (!%p2057_p5), %v1564_v6, %v2602_v32 }
 0x92c   : > { %v1784_v6 = vrot.slane (!%p2057_p5), %v1764_v58, %v2597_v29 }
 0x92d   : > { %v1507_v19 = vsel %vm673_vm2, %v1505_v5, 0.0  ;;  %v1506_v20 = vadd.f32 %v1501_v17, %v1332_v41 }
 0x92e   : > { %1508 = vadd.xlane.f32.xlu0 %v1507_v19 }
 0x92f   : > { %v1510_v21 = vsel %vm673_vm2, %v1506_v20, 0.0 }
 0x930   : > { %1511 = vadd.xlane.f32.xlu1 %v1510_v21 }
 0x9bb   : > { %v1509_v14 = vpop.xlane.xlu0 %1508 }
 0x9bc   : > { %v1513_v11 = vmul.f32 0.03125, %v1509_v14 }
 0x9bd   : > { %v1512_v22 = vpop.xlane.xlu1 %1511 }
 0x9be   : > { %v1515_v23 = vsub.f32 %v1505_v5, %v1513_v11  ;;  %v1514_v24 = vmul.f32 0.03125, %v1512_v22 }
 0x9c0   : > { %v1516_v25 = vsub.f32 %v1506_v20, %v1514_v24  ;;  %v1517_v26 = vmul.f32 %v1515_v23, %v1515_v23 }
 0x9c2   : > { %v1519_v27 = vsel %vm673_vm2, %v1517_v26, 0.0  ;;  %v1518_v30 = vmul.f32 %v1516_v25, %v1516_v25 }
 0x9c3   : > { %1520 = vadd.xlane.f32.xlu0 %v1519_v27 }
 0x9c4   : > { %v1522_v31 = vsel %vm673_vm2, %v1518_v30, 0.0 }
 0x9c5   : > { %1523 = vadd.xlane.f32.xlu1 %v1522_v31 }
 0xa50   : > { %v1521_v33 = vpop.xlane.xlu0 %1520 }
 0xa51   : > { %v1525_v34 = vmul.f32 0.03125, %v1521_v33 }
 0xa52   : > { %v1524_v35 = vpop.xlane.xlu1 %1523 }
 0xa53   : > { %v1527_v36 = vadd.f32 1e-12, %v1525_v34  ;;  %v1526_v37 = vmul.f32 0.03125, %v1524_v35 }
 0xa55   : > { %2257 = vrsqrt.f32 %v1527_v36  ;;  %v1528_v38 = vadd.f32 1e-12, %v1526_v37 }
 0xa57   : > { %2259 = vrsqrt.f32 %v1528_v38 }
 0xa5f   : > { %v2258_v41 = vpop.eup %2257 }
 0xa60   : > { %v1531_v43 = vmul.f32 %v2258_v41, %v1515_v23 }
 0xa61   : > { %v2260_v44 = vpop.eup %2259 }
 0xa62   : > { %v1537_v45 = vmul.f32 %v1536_v40, %v1531_v43  ;;  %v1532_v46 = vmul.f32 %v2260_v44, %v1516_v25 }
 0xa64   : > { %v1543_v47 = vadd.f32 %v1542_v42, %v1537_v45  ;;  %v1538_v48 = vmul.f32 %v1536_v40, %v1532_v46  ;;  %1553 = sbr.rel (%p2057_p5) target bundleno = 3230 (0xc9e), region = 88 }
 0xa66   : > { %v1545_v49 = vpack.c.bf16 %v1543_v47, %v1543_v47  ;;  %v1544_v50 = vadd.f32 %v1542_v42, %v1538_v48 }
 0xa68   : > { %1548 = vst.msk [vmem:[#allocation2] sm:$0xf] %vm1547_vm7, %v1545_v49  ;;  %v1546_v51 = vpack.c.bf16 %v1544_v50, %v1544_v50 }
 0xa6a   : > { %1549 = vst.msk [vmem:[#allocation2 + $0x4] sm:$0xf] %vm1547_vm7, %v1546_v51 }
 0xa6f   : > { %v2273_v60 = vld [vmem:[#allocation2] ss:$0 sps:$4 sm:$0x11]  }
 0xa70   : > { %v1592_v62 = vunpack.c.l.b16 %v2273_v60  ;;  %v1776_v60 = vrot.slane %v1723_v53, %v1775_v55 }
 0xa71   : > { %v2274_v61 = vld [vmem:[#allocation2 + $0x4] ss:$0 sps:$4 sm:$0x11]  }
 0xa72   : > { %v1593_v63 = vunpack.c.l.b16 %v2274_v61  ;;  %v1804_v61 = vrot.slane %v1723_v53, %v2602_v32 }
 0xa74   : > { %v1594_v0 = vrot.slane %v1593_v63, 7  ;;  %v1816_v63 = vrot.slane %v1723_v53, %v1815_v57  ;;  %v1824_v4 = vrot.slane %v1804_v61, %v2602_v32 }
 0xa76   : > { %v1596_v1 = vsel %vm1595_vm8, %v1594_v0, %v1592_v62  ;;  %v1812_v62 = vrot.slane %v1723_v53, %v1811_v56  ;;  %v1808_v0 = vrot.slane %v1723_v53, %v1580_v7 }
 0xa77   : > { %v1597_v2 = vpack.c.b16 %v1596_v1, %v1596_v1  ;;  %v2323_v1 = vmov 1983009808  }
 0xa79   : > { %2068 = vmatmul.mubr.msk.bf16.vlgmr.msra.gmra.mrb[0].mxu0 %vm673_vm2, %v1597_v2  ;;  %2069 = vmatmul.mubr.msk.bf16.vlgmr.msra.gmra.mrb[0].mxu1 %vm673_vm2, %v1597_v2  ;;  %v1852_v2 = vunpack.c.l.s4 %v2323_v1 }
 0xb4c   : > { %v1675_v12 = vpop.f32.mrb[0].mxu0  ;;  %v1716_v13 = vpop.f32.mrb[0].mxu1 }
 0xb4d   : > { %v1676_v16 = vadd.f32 %v1675_v12, %v1569_v8  ;;  %v1717_v17 = vadd.f32 %v1716_v13, %v1577_v9  ;;  %v1677_v18 = vpop.f32.mrb[1].mxu0  ;;  %v1718_v5 = vpop.f32.mrb[1].mxu1  ;;  %v1788_v8 = vrot.slane %v1768_v59, %v2597_v29  ;;  %v1792_v9 = vrot.slane %v1772_v3, %v2597_v29 }
 0xb4e   : > { %v1678_v19 = vadd.f32 %v1677_v18, %v1573_v10  ;;  %v1679_v20 = vpop.f32.mrb[2].mxu0  ;;  %v1720_v21 = vpop.f32.mrb[2].mxu1  ;;  %v1719_v25 = vadd.f32 %v1718_v5, %v1581_v15  ;;  %v1796_v10 = vrot.slane %v1776_v60, %v2597_v29  ;;  %v1832_v13 = vrot.slane %v1812_v62, %v2602_v32 }
 0xb4f   : > { %v1725_v14 = vsel %vm1724_vm9, %v1676_v16, 0.0  ;;  %v1680_v11 = vpop.f32.mrb[3].mxu0  ;;  %v1721_v22 = vpop.f32.mrb[3].mxu1  ;;  %v1728_v23 = vsel %vm1724_vm9, %v1717_v17, 0.0  ;;  %v1836_v15 = vrot.slane %v1816_v63, %v2602_v32 }
 0xb50   : > { %v1726_v24 = vsel %vm1724_vm9, %v1678_v19, 0.0  ;;  %v1730_v30 = vsel %vm1724_vm9, %v1719_v25, 0.0 }
 0xb51   : > { %v1727_v26 = vadd.f32 %v1726_v24, %v1725_v14 }
 0xb53   : > { %v1729_v27 = vadd.f32 %v1728_v23, %v1727_v26 }
 0xb55   : > { %v1731_v31 = vadd.f32 %v1730_v30, %v1729_v27 }
 0xb57   : > { %1732 = vadd.xlane.f32.xlu0 %v1731_v31 }
 0xbe4   : > { %v1733_v33 = vpop.xlane.xlu0 %1732 }
 0xbe5   : > { %v1735_v34 = vmul.f32 0.001953125, %v1733_v33 }
 0xbe7   : > { %v1736_v35 = vsub.f32 %v1676_v16, %v1735_v34  ;;  %v1737_v36 = vsub.f32 %v1678_v19, %v1735_v34  ;;  %v1738_v37 = vsub.f32 %v1717_v17, %v1735_v34  ;;  %v1739_v38 = vsub.f32 %v1719_v25, %v1735_v34 }
 0xbe8   : > { %v1828_v16 = vrot.slane %v1808_v0, %v2602_v32  ;;  %v1853_v19 = vunpack.c.0.s8 %v1852_v2 }
 0xbe9   : > { %v1740_v39 = vmul.f32 %v1736_v35, %v1736_v35  ;;  %v1741_v40 = vmul.f32 %v1737_v36, %v1737_v36  ;;  %v1742_v41 = vmul.f32 %v1738_v37, %v1738_v37  ;;  %v1743_v42 = vmul.f32 %v1739_v38, %v1739_v38 }
 0xbea   : > { %v1856_v25 = vsub.s32 %v1853_v19, %v2594_v28 }
 0xbeb   : > { %v1744_v43 = vsel %vm1724_vm9, %v1740_v39, 0.0  ;;  %v1745_v44 = vsel %vm1724_vm9, %v1741_v40, 0.0  ;;  %v1747_v46 = vsel %vm1724_vm9, %v1742_v41, 0.0  ;;  %v1749_v48 = vsel %vm1724_vm9, %v1743_v42, 0.0 }
 0xbec   : > { %v1746_v45 = vadd.f32 %v1745_v44, %v1744_v43 }
 0xbee   : > { %v1748_v47 = vadd.f32 %v1747_v46, %v1746_v45 }
 0xbf0   : > { %v1750_v49 = vadd.f32 %v1749_v48, %v1748_v47 }
 0xbf2   : > { %1751 = vadd.xlane.f32.xlu0 %v1750_v49 }
 0xc7f   : > { %v1752_v50 = vpop.xlane.xlu0 %1751 }
 0xc80   : > { %v1753_v51 = vmul.f32 0.001953125, %v1752_v50 }
 0xc82   : > { %v1754_v52 = vadd.f32 1e-05, %v1753_v51 }
 0xc84   : > { %2275 = vrsqrt.f32 %v1754_v52 }
 0xc8e   : > { %v2276_v12 = vpop.eup %2275 }
 0xc8f   : > { %v1756_v7 = vmul.f32 %v2276_v12, %v1736_v35  ;;  %v1757_v17 = vmul.f32 %v2276_v12, %v1737_v36  ;;  %v1758_v18 = vmul.f32 %v2276_v12, %v1738_v37  ;;  %v1759_v5 = vmul.f32 %v2276_v12, %v1739_v38 }
 0xc91   : > { %v1797_v20 = vmul.f32 %v1784_v6, %v1756_v7  ;;  %v1798_v21 = vmul.f32 %v1788_v8, %v1757_v17  ;;  %v1799_v14 = vmul.f32 %v1792_v9, %v1758_v18  ;;  %v1800_v11 = vmul.f32 %v1796_v10, %v1759_v5 }
 0xc93   : > { %v1837_v22 = vadd.f32 %v1824_v4, %v1797_v20  ;;  %v1838_v29 = vadd.f32 %v1828_v16, %v1798_v21  ;;  %v1839_v23 = vadd.f32 %v1832_v13, %v1799_v14  ;;  %v1840_v24 = vadd.f32 %v1836_v15, %v1800_v11 }
 0xc95   : > { %v1841_v26 = vmax.f32 %v1837_v22, 0.0  ;;  %v1842_v27 = vmax.f32 %v1838_v29, 0.0  ;;  %v1843_v30 = vmax.f32 %v1839_v23, 0.0  ;;  %v1844_v31 = vmax.f32 %v1840_v24, 0.0 }
 0xc97   : > { %v1849_v32 = vcombine.low %v1841_v26, %v1842_v27  ;;  %v1850_v33 = vcombine.low %v1843_v30, %v1844_v31 }
 0xc99   : > { %v1857_v34 = vrot.slane %v1849_v32, %v1856_v25  ;;  %v1864_v35 = vrot.slane %v1850_v33, %v1856_v25 }
 0xc9b   : > { %v1865_v36 = vcombine.low %v1857_v34, %v1864_v35 }
 0xc9d   : > { %1867 = vst [vmem:[#allocation3] sm:$0xff] %v1865_v36 }
 0xc9e PF: > { %p2201_p6 = scmp.eq.s32.totalorder %s2411_s19, 1  ;;  %s2324_s15 = smov [#allocation3]  }
 0xc9f   : > { %s1875_s18 = sshll.u32 %s2324_s15, 4  ;;  %s1876_s18 = int_to_ptr.vmem [resolvable:$true] %s1875_s18 }
 0xca0   : > { %s2277_s27 = scalar_lea.vmem %s1876_s18, 128  ;;  %p2284_p10 = scmp.lt.s32.totalorder %s1876_s18, %s1876_s18 }
 0xca1   : > { %p2278_p7 = scmp.ne.s32.totalorder %s1876_s18, %s2277_s27  ;;  %p2285_p11 = scmp.lt.s32.totalorder %s2277_s27, %s2277_s27 }
 0xca3   : > { %p2279_p8 = pnand %p2278_p7, %p2201_p6  ;;  %p2286_p12 = por %p2285_p11, %p2284_p10 }
 0xca5   : > { %p2280_p9 = pneg %p2279_p8 }
 0xca7   : > { %p2287_p13 = pnand %p2286_p12, %p2280_p9 }
 0xca9   : > { %2290 = shalt.err (!%p2287_p13)
}
 0xcaa   : > { %s2751_s29 = sld [smem:[#allocation13_spill]] }
 0xcb0   : > { %s2291_s17 = scalar_lea.hbm %s2751_s29, 128 }
 0xcb1   : > { %p2292_p0 = scmp.ne.s32.totalorder %s2751_s29, %s2291_s17  ;;  %p2297_p3 = scmp.lt.u32.totalorder %s2291_s17, %s2751_s29 }
 0xcb3   : > { %p2293_p1 = pnand %p2292_p0, %p2201_p6 }
 0xcb5   : > { %p2294_p2 = pneg %p2293_p1 }
 0xcb7   : > { %p2299_p4 = pnand %p2297_p3, %p2294_p2 }
 0xcb9   : > { %2302 = shalt.err (!%p2299_p4)
}
 0xcba   : > { %2198 = dma.vmem_to_hbm [thread:$0]  (%p2201_p6), %s1876_s18, 128, %s2751_s29, [#allocation4]  }
 0xcbb   : > { %2308 = dma.done.wait (%p2201_p6), [#allocation4], 128  }
 0xcbc   : > { %2310 = vsyncadd (%p2201_p6), [#allocation4], 4294967168 }
 0xcbd PF: > { %s2752_s6 = sld [smem:[#allocation6_spill]] }
 0xcc3   : > { %s26_s18 = sadd.s32 1, %s2752_s6  }
 0xcc4   : > { %p23_p5 = scmp.ge.s32.totalorder %s26_s18, 4  }
 0xcc6   :  { %25 = sbr.rel (!%p23_p5) target bundleno = 9 (0x9), region = 143 }
 0xccd   :  { %1888 = vsyncpa [#allocation4], 1 }
 0xcce   :  { %1890 = vsyncpa [#allocation4 + $0x1], 1 }

</bundles_post_ra>
